<compile_context>
chip_gen: v6e
topology: v6e:2x2x1
jax: 0.10.0
libtpu: 0.0.40
codegen_flags: <defaults>
</compile_context>

<pallas_src>
import functools

import jax
import jax.numpy as jnp
from jax import lax
from jax.experimental import pallas as pl
from jax.experimental.pallas import tpu as pltpu


# ------------------------- hoisted projection matmul --------------------------

def _matmul_bias_kernel(x_ref, w_ref, b_ref, o_ref):
    # x cast to bf16 in-kernel (halves vreg/VMEM pressure for the MXU operands),
    # f32 accumulation, bias added in f32.
    o_ref[...] = (jnp.dot(x_ref[...].astype(jnp.bfloat16), w_ref[...],
                          preferred_element_type=jnp.float32) + b_ref[...])


def matmul_bias(x2d, w_bf16, b_f32, *, block_rows=256):
    """Row-tiled (N, D) @ (D, F) + b on the MXU. Weights are bf16, output f32."""
    N, D = x2d.shape
    F = w_bf16.shape[-1]
    if N <= block_rows:
        # Single whole-array block (toy sizes).
        return pl.pallas_call(
            _matmul_bias_kernel,
            out_shape=jax.ShapeDtypeStruct((N, F), jnp.float32),
        )(x2d, w_bf16, b_f32)
    return pl.pallas_call(
        _matmul_bias_kernel,
        grid_spec=pltpu.PrefetchScalarGridSpec(
            num_scalar_prefetch=0,
            grid=(pl.cdiv(N, block_rows),),
            in_specs=[
                pl.BlockSpec((block_rows, D), lambda i: (i, 0)),
                pl.BlockSpec((D, F), lambda i: (0, 0)),
                pl.BlockSpec((1, F), lambda i: (0, 0)),
            ],
            out_specs=pl.BlockSpec((block_rows, F), lambda i: (i, 0)),
        ),
        out_shape=jax.ShapeDtypeStruct((N, F), jnp.float32),
        compiler_params=pltpu.CompilerParams(dimension_semantics=("parallel",)),
    )(x2d, w_bf16, b_f32)


# ----------------------------- LSTM recurrence kernel --------------------------

def _sigmoid_via_tanh(z):
    # sigmoid(x) = 0.5*tanh(0.5x) + 0.5: one EUP op instead of exp + reciprocal.
    return 0.5 * jnp.tanh(0.5 * z) + 0.5


def _make_lstm_kernel(project: bool):
    """Builds the recurrence kernel; if `project`, fuses the final Linear."""

    def kernel(xw_ref, h0_ref, c0_ref, w_hh_ref, *rest):
        if project:
            w_lin_ref, b_lin_ref, out_ref, hT_ref, cT_ref = rest
        else:
            out_ref, hT_ref, cT_ref = rest

        # Recurrent state lives in the resident (constant-index) hT/cT outputs.
        @pl.when(pl.program_id(0) == 0)
        def _():
            hT_ref[...] = h0_ref[...]
            cT_ref[...] = c0_ref[...]

        H = hT_ref.shape[-1]
        block_t = xw_ref.shape[0]

        def step(s, carry):
            h, c = carry
            # x @ W_ih^T + b was hoisted out; only the recurrent matmul runs here.
            gates = xw_ref[s] + jnp.dot(h.astype(jnp.bfloat16), w_hh_ref[...],
                                        preferred_element_type=jnp.float32)
            i_g = _sigmoid_via_tanh(gates[:, 0 * H:1 * H])
            f_g = _sigmoid_via_tanh(gates[:, 1 * H:2 * H])
            g_g = jnp.tanh(gates[:, 2 * H:3 * H])
            o_g = _sigmoid_via_tanh(gates[:, 3 * H:4 * H])
            c_new = f_g * c + i_g * g_g
            h_new = o_g * jnp.tanh(c_new)
            if project:
                # Fused Linear head on the in-VMEM hidden state (lane-dense O_pad).
                out_ref[s] = (jnp.dot(h_new.astype(jnp.bfloat16), w_lin_ref[...],
                                      preferred_element_type=jnp.float32)
                              + b_lin_ref[...])
            else:
                out_ref[s] = h_new
            return h_new, c_new

        h_fin, c_fin = lax.fori_loop(0, block_t, step,
                                     (hT_ref[...], cT_ref[...]), unroll=True)
        hT_ref[...] = h_fin
        cT_ref[...] = c_fin

    return kernel


def lstm_layer(xw, h0, c0, w_hh_bf16, *, block_t, w_lin_bf16=None, b_lin=None):
    """Run the recurrence for one layer over precomputed gate pre-activations.

    xw: (T, B, 4H) f32 = x @ W_ih^T + b_ih + b_hh (hoisted projection).
    Returns (y_or_projected_output, h_T, c_T).
    """
    T, B, G = xw.shape
    H = h0.shape[-1]
    project = w_lin_bf16 is not None
    Fo = w_lin_bf16.shape[-1] if project else H

    in_specs = [
        pl.BlockSpec((block_t, B, G), lambda t: (t, 0, 0)),   # hoisted x-projection
        pl.BlockSpec((B, H), lambda t: (0, 0)),               # h0
        pl.BlockSpec((B, H), lambda t: (0, 0)),               # c0
        pl.BlockSpec((H, G), lambda t: (0, 0)),               # W_hh^T (bf16, resident)
    ]
    args = [xw, h0, c0, w_hh_bf16]
    if project:
        in_specs += [pl.BlockSpec((H, Fo), lambda t: (0, 0)),  # W_lin^T (bf16, padded)
                     pl.BlockSpec((1, Fo), lambda t: (0, 0))]  # b_lin (padded)
        args += [w_lin_bf16, b_lin]

    out_specs = [
        pl.BlockSpec((block_t, B, Fo), lambda t: (t, 0, 0)),   # y / projected output
        pl.BlockSpec((B, H), lambda t: (0, 0)),                # h_T (resident state)
        pl.BlockSpec((B, H), lambda t: (0, 0)),                # c_T (resident state)
    ]
    out_shape = (jax.ShapeDtypeStruct((T, B, Fo), jnp.float32),
                 jax.ShapeDtypeStruct((B, H), jnp.float32),
                 jax.ShapeDtypeStruct((B, H), jnp.float32))

    return pl.pallas_call(
        _make_lstm_kernel(project),
        grid_spec=pltpu.PrefetchScalarGridSpec(
            num_scalar_prefetch=0,
            grid=(T // block_t,),
            in_specs=in_specs,
            out_specs=out_specs,
        ),
        out_shape=out_shape,
        compiler_params=pltpu.CompilerParams(dimension_semantics=("arbitrary",)),
    )(*args)


# ------------------------------ VanillaLstm glue -------------------------------

def init_params(key, input_size, hidden_size, output_size, num_layers):
    """PyTorch-style U(-1/sqrt(H), 1/sqrt(H)) init, packed into kernel layout."""
    k = 1.0 / jnp.sqrt(hidden_size)
    params = {"layers": []}
    for layer in range(num_layers):
        d_in = input_size if layer == 0 else hidden_size
        key, k1, k2, k3, k4 = jax.random.split(key, 5)
        w_ih = jax.random.uniform(k1, (4 * hidden_size, d_in), jnp.float32, -k, k)
        w_hh = jax.random.uniform(k2, (4 * hidden_size, hidden_size), jnp.float32, -k, k)
        b_ih = jax.random.uniform(k3, (4 * hidden_size,), jnp.float32, -k, k)
        b_hh = jax.random.uniform(k4, (4 * hidden_size,), jnp.float32, -k, k)
        params["layers"].append({
            "w_ih_t": jnp.transpose(w_ih).astype(jnp.bfloat16),   # (D_in, 4H) bf16
            "w_hh_t": jnp.transpose(w_hh).astype(jnp.bfloat16),   # (H, 4H)   bf16
            "b": (b_ih + b_hh).reshape(1, 4 * hidden_size),       # (1, 4H)   f32
        })
    key, k5, k6 = jax.random.split(key, 3)
    w_lin = jax.random.uniform(k5, (output_size, hidden_size), jnp.float32, -k, k)
    b_lin = jax.random.uniform(k6, (output_size,), jnp.float32, -k, k)
    # Pad the Linear output dim to a lane-dense multiple of 128 (sliced in wrapper).
    o_pad = ((output_size + 127) // 128) * 128
    w_lin_t = jnp.zeros((hidden_size, o_pad), jnp.float32).at[:, :output_size].set(
        jnp.transpose(w_lin))
    b_lin_p = jnp.zeros((1, o_pad), jnp.float32).at[:, :output_size].set(b_lin)
    params["w_lin_t"] = w_lin_t.astype(jnp.bfloat16)              # (H, O_pad) bf16
    params["b_lin"] = b_lin_p                                     # (1, O_pad) f32
    return params


def _largest_divisor_leq(n, cap):
    tc = max(1, min(cap, n))
    while n % tc:
        tc -= 1
    return tc


@functools.partial(jax.jit, static_argnames=("output_size", "block_t"))
def vanilla_lstm_forward(x, h, c, params, *, output_size, block_t=8):
    """x: (T, B, D_in), h/c: (L, B, H) -> (output (T,B,O), hidden (L,B,H), cell (L,B,H))."""
    T, B, _ = x.shape
    n_layers = len(params["layers"])
    tc = _largest_divisor_leq(T, block_t)

    layer_in = x
    h_finals, c_finals = [], []
    output = None
    for layer, p in enumerate(params["layers"]):
        d_in = layer_in.shape[-1]
        # Hoisted input projection: one large (T*B, D) @ (D, 4H) MXU matmul.
        xw = matmul_bias(layer_in.reshape(T * B, d_in), p["w_ih_t"], p["b"])
        xw = xw.reshape(T, B, -1)
        if layer == n_layers - 1:
            # Last layer: Linear head fused into the recurrence kernel.
            y, hT, cT = lstm_layer(xw, h[layer], c[layer], p["w_hh_t"],
                                   block_t=tc,
                                   w_lin_bf16=params["w_lin_t"],
                                   b_lin=params["b_lin"])
            output = y[..., :output_size]
        else:
            y, hT, cT = lstm_layer(xw, h[layer], c[layer], p["w_hh_t"], block_t=tc)
            layer_in = y
        h_finals.append(hT)
        c_finals.append(cT)
    return output, jnp.stack(h_finals, axis=0), jnp.stack(c_finals, axis=0)


# ------------------------------ pure-JAX reference ------------------------------

def _ref_forward(x, h, c, params, output_size):
    """Reference with the same bf16-operand / f32-accumulate matmul convention."""
    def bdot(a, b):
        return jnp.dot(a.astype(jnp.bfloat16), b, preferred_element_type=jnp.float32)

    layer_in = x
    h_finals, c_finals = [], []
    Hh = h.shape[-1]
    for layer, p in enumerate(params["layers"]):
        def step(carry, x_t, p=p):
            h_prev, c_prev = carry
            gates = bdot(x_t, p["w_ih_t"]) + bdot(h_prev, p["w_hh_t"]) + p["b"]
            i = jax.nn.sigmoid(gates[:, 0 * Hh:1 * Hh])
            f = jax.nn.sigmoid(gates[:, 1 * Hh:2 * Hh])
            g = jnp.tanh(gates[:, 2 * Hh:3 * Hh])
            o = jax.nn.sigmoid(gates[:, 3 * Hh:4 * Hh])
            c_new = f * c_prev + i * g
            h_new = o * jnp.tanh(c_new)
            return (h_new, c_new), h_new
        (hT, cT), y = lax.scan(step, (h[layer], c[layer]), layer_in)
        h_finals.append(hT)
        c_finals.append(cT)
        layer_in = y
    out = (bdot(layer_in, params["w_lin_t"]) + params["b_lin"])[..., :output_size]
    return out, jnp.stack(h_finals), jnp.stack(c_finals)


# ------------------------------------ main --------------------------------------

if __name__ == "__main__":
    seq_len, batch = 8, 2
    input_size, hidden_size, output_size, num_layers = 4, 32, 3, 2

    key = jax.random.PRNGKey(0)
    key, kx = jax.random.split(key)
    params = init_params(key, input_size, hidden_size, output_size, num_layers)

    x = jax.random.normal(kx, (seq_len, batch, input_size), jnp.float32)
    # hc_init: zeros
    h0 = jnp.zeros((num_layers, batch, hidden_size), jnp.float32)
    c0 = jnp.zeros((num_layers, batch, hidden_size), jnp.float32)

    output, hidden, cell = vanilla_lstm_forward(
        x, h0, c0, params, output_size=output_size, block_t=4)
    jax.block_until_ready((output, hidden, cell))

    ref_out, ref_h, ref_c = _ref_forward(x, h0, c0, params, output_size)
    assert output.shape == (seq_len, batch, output_size)
    assert jnp.allclose(output, ref_out, atol=5e-4, rtol=5e-4)
    assert jnp.allclose(hidden, ref_h, atol=5e-4, rtol=5e-4)
    assert jnp.allclose(cell, ref_c, atol=5e-4, rtol=5e-4)

    print("KERNEL_OK")
</pallas_src>

<mosaic_0001>
module attributes {stable_mosaic.version = 11 : i64} {
  func.func @_matmul_bias_kernel(%arg0: memref<16x4xf32, #tpu.memory_space<vmem>>, %arg1: memref<4x128xbf16, #tpu.memory_space<vmem>>, %arg2: memref<1x128xf32, #tpu.memory_space<vmem>>, %arg3: memref<16x128xf32, #tpu.memory_space<vmem>>) attributes {dimension_semantics = [], scalar_prefetch = 0 : i64, scratch_operands = 0 : i64, tpu.core_type = #tpu.core_type<tc>} {
    %c0 = arith.constant 0 : index
    %c0_0 = arith.constant 0 : index
    %0 = vector.load %arg0[%c0, %c0_0] : memref<16x4xf32, #tpu.memory_space<vmem>>, vector<16x4xf32>
    %1 = arith.truncf %0 : vector<16x4xf32> to vector<16x4xbf16>
    %c0_1 = arith.constant 0 : index
    %c0_2 = arith.constant 0 : index
    %2 = vector.load %arg1[%c0_1, %c0_2] : memref<4x128xbf16, #tpu.memory_space<vmem>>, vector<4x128xbf16>
    %cst = arith.constant dense<0.000000e+00> : vector<16x128xf32>
    %3 = tpu.matmul %1, %2, %cst {dimension_numbers = #tpu.dot_dimension_numbers<[1], [0], [0], [1], [0, 0, 1, 1], [], []>} : vector<16x4xbf16>, vector<4x128xbf16>, vector<16x128xf32> -> vector<16x128xf32>
    %c0_3 = arith.constant 0 : index
    %c0_4 = arith.constant 0 : index
    %4 = vector.load %arg2[%c0_3, %c0_4] : memref<1x128xf32, #tpu.memory_space<vmem>>, vector<1x128xf32>
    %5 = vector.broadcast %4 : vector<1x128xf32> to vector<16x128xf32>
    %6 = arith.addf %3, %5 : vector<16x128xf32>
    %c0_5 = arith.constant 0 : index
    %c0_6 = arith.constant 0 : index
    %7 = vector.load %arg3[%c0_5, %c0_6] : memref<16x128xf32, #tpu.memory_space<vmem>>, vector<16x128xf32>
    tpu.vector_store %arg3[%c0_5, %c0_6], %6 {strides = array<i32>} : memref<16x128xf32, #tpu.memory_space<vmem>>, vector<16x128xf32>,
    return
  }
}

module attributes {stable_mosaic.version = 11 : i64} {
  func.func @kernel(%arg0: i32, %arg1: memref<4x2x128xf32, #tpu.memory_space<vmem>>, %arg2: memref<2x32xf32, #tpu.memory_space<vmem>>, %arg3: memref<2x32xf32, #tpu.memory_space<vmem>>, %arg4: memref<32x128xbf16, #tpu.memory_space<vmem>>, %arg5: memref<4x2x32xf32, #tpu.memory_space<vmem>>, %arg6: memref<2x32xf32, #tpu.memory_space<vmem>>, %arg7: memref<2x32xf32, #tpu.memory_space<vmem>>) attributes {dimension_semantics = [#tpu.dimension_semantics<arbitrary>], iteration_bounds = array<i64: 2>, scalar_prefetch = 0 : i64, scratch_operands = 0 : i64, tpu.core_type = #tpu.core_type<tc>, window_params = [{transform_indices = @transform_0, window_bounds = array<i64: 4, 2, 128>}, {pipeline_mode = #tpu.pipeline_mode<synchronous>, transform_indices = @transform_1, window_bounds = array<i64: 2, 32>}, {pipeline_mode = #tpu.pipeline_mode<synchronous>, transform_indices = @transform_2, window_bounds = array<i64: 2, 32>}, {pipeline_mode = #tpu.pipeline_mode<synchronous>, transform_indices = @transform_3, window_bounds = array<i64: 32, 128>}, {transform_indices = @transform_4, window_bounds = array<i64: 4, 2, 32>}, {pipeline_mode = #tpu.pipeline_mode<synchronous>, transform_indices = @transform_5, window_bounds = array<i64: 2, 32>}, {pipeline_mode = #tpu.pipeline_mode<synchronous>, transform_indices = @transform_6, window_bounds = array<i64: 2, 32>}]} {
    %c0_i32 = arith.constant 0 : i32
    %0 = arith.cmpi eq, %arg0, %c0_i32 : i32
    %1 = arith.extui %0 : i1 to i32
    %c0_i32_0 = arith.constant 0 : i32
    %2 = arith.cmpi ne, %1, %c0_i32_0 : i32
    scf.if %2 {
      %c0_72 = arith.constant 0 : index
      %c0_73 = arith.constant 0 : index
      %175 = vector.load %arg2[%c0_72, %c0_73] : memref<2x32xf32, #tpu.memory_space<vmem>>, vector<2x32xf32>
      %c0_74 = arith.constant 0 : index
      %c0_75 = arith.constant 0 : index
      %176 = vector.load %arg6[%c0_74, %c0_75] : memref<2x32xf32, #tpu.memory_space<vmem>>, vector<2x32xf32>
      tpu.vector_store %arg6[%c0_74, %c0_75], %175 {strides = array<i32>} : memref<2x32xf32, #tpu.memory_space<vmem>>, vector<2x32xf32>,
      %c0_76 = arith.constant 0 : index
      %c0_77 = arith.constant 0 : index
      %177 = vector.load %arg3[%c0_76, %c0_77] : memref<2x32xf32, #tpu.memory_space<vmem>>, vector<2x32xf32>
      %c0_78 = arith.constant 0 : index
      %c0_79 = arith.constant 0 : index
      %178 = vector.load %arg7[%c0_78, %c0_79] : memref<2x32xf32, #tpu.memory_space<vmem>>, vector<2x32xf32>
      tpu.vector_store %arg7[%c0_78, %c0_79], %177 {strides = array<i32>} : memref<2x32xf32, #tpu.memory_space<vmem>>, vector<2x32xf32>,
    } else {
    }
    %c0 = arith.constant 0 : index
    %c0_1 = arith.constant 0 : index
    %3 = vector.load %arg6[%c0, %c0_1] : memref<2x32xf32, #tpu.memory_space<vmem>>, vector<2x32xf32>
    %c0_2 = arith.constant 0 : index
    %c0_3 = arith.constant 0 : index
    %4 = vector.load %arg7[%c0_2, %c0_3] : memref<2x32xf32, #tpu.memory_space<vmem>>, vector<2x32xf32>
    %c0_i32_4 = arith.constant 0 : i32
    %5 = arith.index_cast %c0_i32_4 : i32 to index
    %c0_5 = arith.constant 0 : index
    %c0_6 = arith.constant 0 : index
    %6 = vector.load %arg1[%5, %c0_5, %c0_6] : memref<4x2x128xf32, #tpu.memory_space<vmem>>, vector<1x2x128xf32>
    %7 = vector.shape_cast %6 : vector<1x2x128xf32> to vector<2x128xf32>
    %8 = arith.truncf %3 : vector<2x32xf32> to vector<2x32xbf16>
    %c0_7 = arith.constant 0 : index
    %c0_8 = arith.constant 0 : index
    %9 = vector.load %arg4[%c0_7, %c0_8] : memref<32x128xbf16, #tpu.memory_space<vmem>>, vector<32x128xbf16>
    %cst = arith.constant dense<0.000000e+00> : vector<2x128xf32>
    %10 = tpu.matmul %8, %9, %cst {dimension_numbers = #tpu.dot_dimension_numbers<[1], [0], [0], [1], [0, 0, 1, 1], [], []>} : vector<2x32xbf16>, vector<32x128xbf16>, vector<2x128xf32> -> vector<2x128xf32>
    %11 = arith.addf %7, %10 : vector<2x128xf32>
    %12 = vector.extract_strided_slice %11 {offsets = [0, 0], sizes = [2, 32], strides = [1, 1]} : vector<2x128xf32> to vector<2x32xf32>
    %cst_9 = arith.constant 5.000000e-01 : f32
    %13 = vector.broadcast %cst_9 : f32 to vector<2x32xf32>
    %14 = arith.mulf %13, %12 : vector<2x32xf32>
    %15 = math.tanh %14 : vector<2x32xf32>
    %cst_10 = arith.constant 5.000000e-01 : f32
    %16 = vector.broadcast %cst_10 : f32 to vector<2x32xf32>
    %17 = arith.mulf %16, %15 : vector<2x32xf32>
    %cst_11 = arith.constant 5.000000e-01 : f32
    %18 = vector.broadcast %cst_11 : f32 to vector<2x32xf32>
    %19 = arith.addf %17, %18 : vector<2x32xf32>
    %20 = vector.extract_strided_slice %11 {offsets = [0, 32], sizes = [2, 32], strides = [1, 1]} : vector<2x128xf32> to vector<2x32xf32>
    %cst_12 = arith.constant 5.000000e-01 : f32
    %21 = vector.broadcast %cst_12 : f32 to vector<2x32xf32>
    %22 = arith.mulf %21, %20 : vector<2x32xf32>
    %23 = math.tanh %22 : vector<2x32xf32>
    %cst_13 = arith.constant 5.000000e-01 : f32
    %24 = vector.broadcast %cst_13 : f32 to vector<2x32xf32>
    %25 = arith.mulf %24, %23 : vector<2x32xf32>
    %cst_14 = arith.constant 5.000000e-01 : f32
    %26 = vector.broadcast %cst_14 : f32 to vector<2x32xf32>
    %27 = arith.addf %25, %26 : vector<2x32xf32>
    %28 = vector.extract_strided_slice %11 {offsets = [0, 64], sizes = [2, 32], strides = [1, 1]} : vector<2x128xf32> to vector<2x32xf32>
    %29 = math.tanh %28 : vector<2x32xf32>
    %30 = vector.extract_strided_slice %11 {offsets = [0, 96], sizes = [2, 32], strides = [1, 1]} : vector<2x128xf32> to vector<2x32xf32>
    %cst_15 = arith.constant 5.000000e-01 : f32
    %31 = vector.broadcast %cst_15 : f32 to vector<2x32xf32>
    %32 = arith.mulf %31, %30 : vector<2x32xf32>
    %33 = math.tanh %32 : vector<2x32xf32>
    %cst_16 = arith.constant 5.000000e-01 : f32
    %34 = vector.broadcast %cst_16 : f32 to vector<2x32xf32>
    %35 = arith.mulf %34, %33 : vector<2x32xf32>
    %cst_17 = arith.constant 5.000000e-01 : f32
    %36 = vector.broadcast %cst_17 : f32 to vector<2x32xf32>
    %37 = arith.addf %35, %36 : vector<2x32xf32>
    %38 = arith.mulf %27, %4 : vector<2x32xf32>
    %39 = arith.mulf %19, %29 : vector<2x32xf32>
    %40 = arith.addf %38, %39 : vector<2x32xf32>
    %41 = math.tanh %40 : vector<2x32xf32>
    %42 = arith.mulf %37, %41 : vector<2x32xf32>
    %43 = arith.index_cast %c0_i32_4 : i32 to index
    %c0_18 = arith.constant 0 : index
    %c0_19 = arith.constant 0 : index
    %44 = vector.load %arg5[%43, %c0_18, %c0_19] : memref<4x2x32xf32, #tpu.memory_space<vmem>>, vector<1x2x32xf32>
    %45 = vector.shape_cast %44 : vector<1x2x32xf32> to vector<2x32xf32>
    %46 = vector.shape_cast %42 : vector<2x32xf32> to vector<1x2x32xf32>
    tpu.vector_store %arg5[%43, %c0_18, %c0_19], %46 {strides = array<i32>} : memref<4x2x32xf32, #tpu.memory_space<vmem>>, vector<1x2x32xf32>,
    %c1_i32 = arith.constant 1 : i32
    %47 = arith.index_cast %c1_i32 : i32 to index
    %c0_20 = arith.constant 0 : index
    %c0_21 = arith.constant 0 : index
    %48 = vector.load %arg1[%47, %c0_20, %c0_21] : memref<4x2x128xf32, #tpu.memory_space<vmem>>, vector<1x2x128xf32>
    %49 = vector.shape_cast %48 : vector<1x2x128xf32> to vector<2x128xf32>
    %50 = arith.truncf %42 : vector<2x32xf32> to vector<2x32xbf16>
    %c0_22 = arith.constant 0 : index
    %c0_23 = arith.constant 0 : index
    %51 = vector.load %arg4[%c0_22, %c0_23] : memref<32x128xbf16, #tpu.memory_space<vmem>>, vector<32x128xbf16>
    %cst_24 = arith.constant dense<0.000000e+00> : vector<2x128xf32>
    %52 = tpu.matmul %50, %51, %cst_24 {dimension_numbers = #tpu.dot_dimension_numbers<[1], [0], [0], [1], [0, 0, 1, 1], [], []>} : vector<2x32xbf16>, vector<32x128xbf16>, vector<2x128xf32> -> vector<2x128xf32>
    %53 = arith.addf %49, %52 : vector<2x128xf32>
    %54 = vector.extract_strided_slice %53 {offsets = [0, 0], sizes = [2, 32], strides = [1, 1]} : vector<2x128xf32> to vector<2x32xf32>
    %cst_25 = arith.constant 5.000000e-01 : f32
    %55 = vector.broadcast %cst_25 : f32 to vector<2x32xf32>
    %56 = arith.mulf %55, %54 : vector<2x32xf32>
    %57 = math.tanh %56 : vector<2x32xf32>
    %cst_26 = arith.constant 5.000000e-01 : f32
    %58 = vector.broadcast %cst_26 : f32 to vector<2x32xf32>
    %59 = arith.mulf %58, %57 : vector<2x32xf32>
    %cst_27 = arith.constant 5.000000e-01 : f32
    %60 = vector.broadcast %cst_27 : f32 to vector<2x32xf32>
    %61 = arith.addf %59, %60 : vector<2x32xf32>
    %62 = vector.extract_strided_slice %53 {offsets = [0, 32], sizes = [2, 32], strides = [1, 1]} : vector<2x128xf32> to vector<2x32xf32>
    %cst_28 = arith.constant 5.000000e-01 : f32
    %63 = vector.broadcast %cst_28 : f32 to vector<2x32xf32>
    %64 = arith.mulf %63, %62 : vector<2x32xf32>
    %65 = math.tanh %64 : vector<2x32xf32>
    %cst_29 = arith.constant 5.000000e-01 : f32
    %66 = vector.broadcast %cst_29 : f32 to vector<2x32xf32>
    %67 = arith.mulf %66, %65 : vector<2x32xf32>
    %cst_30 = arith.constant 5.000000e-01 : f32
    %68 = vector.broadcast %cst_30 : f32 to vector<2x32xf32>
    %69 = arith.addf %67, %68 : vector<2x32xf32>
    %70 = vector.extract_strided_slice %53 {offsets = [0, 64], sizes = [2, 32], strides = [1, 1]} : vector<2x128xf32> to vector<2x32xf32>
    %71 = math.tanh %70 : vector<2x32xf32>
    %72 = vector.extract_strided_slice %53 {offsets = [0, 96], sizes = [2, 32], strides = [1, 1]} : vector<2x128xf32> to vector<2x32xf32>
    %cst_31 = arith.constant 5.000000e-01 : f32
    %73 = vector.broadcast %cst_31 : f32 to vector<2x32xf32>
    %74 = arith.mulf %73, %72 : vector<2x32xf32>
    %75 = math.tanh %74 : vector<2x32xf32>
    %cst_32 = arith.constant 5.000000e-01 : f32
    %76 = vector.broadcast %cst_32 : f32 to vector<2x32xf32>
    %77 = arith.mulf %76, %75 : vector<2x32xf32>
    %cst_33 = arith.constant 5.000000e-01 : f32
    %78 = vector.broadcast %cst_33 : f32 to vector<2x32xf32>
    %79 = arith.addf %77, %78 : vector<2x32xf32>
    %80 = arith.mulf %69, %40 : vector<2x32xf32>
    %81 = arith.mulf %61, %71 : vector<2x32xf32>
    %82 = arith.addf %80, %81 : vector<2x32xf32>
    %83 = math.tanh %82 : vector<2x32xf32>
    %84 = arith.mulf %79, %83 : vector<2x32xf32>
    %85 = arith.index_cast %c1_i32 : i32 to index
    %c0_34 = arith.constant 0 : index
    %c0_35 = arith.constant 0 : index
    %86 = vector.load %arg5[%85, %c0_34, %c0_35] : memref<4x2x32xf32, #tpu.memory_space<vmem>>, vector<1x2x32xf32>
    %87 = vector.shape_cast %86 : vector<1x2x32xf32> to vector<2x32xf32>
    %88 = vector.shape_cast %84 : vector<2x32xf32> to vector<1x2x32xf32>
    tpu.vector_store %arg5[%85, %c0_34, %c0_35], %88 {strides = array<i32>} : memref<4x2x32xf32, #tpu.memory_space<vmem>>, vector<1x2x32xf32>,
    %c2_i32 = arith.constant 2 : i32
    %89 = arith.index_cast %c2_i32 : i32 to index
    %c0_36 = arith.constant 0 : index
    %c0_37 = arith.constant 0 : index
    %90 = vector.load %arg1[%89, %c0_36, %c0_37] : memref<4x2x128xf32, #tpu.memory_space<vmem>>, vector<1x2x128xf32>
    %91 = vector.shape_cast %90 : vector<1x2x128xf32> to vector<2x128xf32>
    %92 = arith.truncf %84 : vector<2x32xf32> to vector<2x32xbf16>
    %c0_38 = arith.constant 0 : index
    %c0_39 = arith.constant 0 : index
    %93 = vector.load %arg4[%c0_38, %c0_39] : memref<32x128xbf16, #tpu.memory_space<vmem>>, vector<32x128xbf16>
    %cst_40 = arith.constant dense<0.000000e+00> : vector<2x128xf32>
    %94 = tpu.matmul %92, %93, %cst_40 {dimension_numbers = #tpu.dot_dimension_numbers<[1], [0], [0], [1], [0, 0, 1, 1], [], []>} : vector<2x32xbf16>, vector<32x128xbf16>, vector<2x128xf32> -> vector<2x128xf32>
    %95 = arith.addf %91, %94 : vector<2x128xf32>
    %96 = vector.extract_strided_slice %95 {offsets = [0, 0], sizes = [2, 32], strides = [1, 1]} : vector<2x128xf32> to vector<2x32xf32>
    %cst_41 = arith.constant 5.000000e-01 : f32
    %97 = vector.broadcast %cst_41 : f32 to vector<2x32xf32>
    %98 = arith.mulf %97, %96 : vector<2x32xf32>
    %99 = math.tanh %98 : vector<2x32xf32>
    %cst_42 = arith.constant 5.000000e-01 : f32
    %100 = vector.broadcast %cst_42 : f32 to vector<2x32xf32>
    %101 = arith.mulf %100, %99 : vector<2x32xf32>
    %cst_43 = arith.constant 5.000000e-01 : f32
    %102 = vector.broadcast %cst_43 : f32 to vector<2x32xf32>
    %103 = arith.addf %101, %102 : vector<2x32xf32>
    %104 = vector.extract_strided_slice %95 {offsets = [0, 32], sizes = [2, 32], strides = [1, 1]} : vector<2x128xf32> to vector<2x32xf32>
    %cst_44 = arith.constant 5.000000e-01 : f32
    %105 = vector.broadcast %cst_44 : f32 to vector<2x32xf32>
    %106 = arith.mulf %105, %104 : vector<2x32xf32>
    %107 = math.tanh %106 : vector<2x32xf32>
    %cst_45 = arith.constant 5.000000e-01 : f32
    %108 = vector.broadcast %cst_45 : f32 to vector<2x32xf32>
    %109 = arith.mulf %108, %107 : vector<2x32xf32>
    %cst_46 = arith.constant 5.000000e-01 : f32
    %110 = vector.broadcast %cst_46 : f32 to vector<2x32xf32>
    %111 = arith.addf %109, %110 : vector<2x32xf32>
    %112 = vector.extract_strided_slice %95 {offsets = [0, 64], sizes = [2, 32], strides = [1, 1]} : vector<2x128xf32> to vector<2x32xf32>
    %113 = math.tanh %112 : vector<2x32xf32>
    %114 = vector.extract_strided_slice %95 {offsets = [0, 96], sizes = [2, 32], strides = [1, 1]} : vector<2x128xf32> to vector<2x32xf32>
    %cst_47 = arith.constant 5.000000e-01 : f32
    %115 = vector.broadcast %cst_47 : f32 to vector<2x32xf32>
    %116 = arith.mulf %115, %114 : vector<2x32xf32>
    %117 = math.tanh %116 : vector<2x32xf32>
    %cst_48 = arith.constant 5.000000e-01 : f32
    %118 = vector.broadcast %cst_48 : f32 to vector<2x32xf32>
    %119 = arith.mulf %118, %117 : vector<2x32xf32>
    %cst_49 = arith.constant 5.000000e-01 : f32
    %120 = vector.broadcast %cst_49 : f32 to vector<2x32xf32>
    %121 = arith.addf %119, %120 : vector<2x32xf32>
    %122 = arith.mulf %111, %82 : vector<2x32xf32>
    %123 = arith.mulf %103, %113 : vector<2x32xf32>
    %124 = arith.addf %122, %123 : vector<2x32xf32>
    %125 = math.tanh %124 : vector<2x32xf32>
    %126 = arith.mulf %121, %125 : vector<2x32xf32>
    %127 = arith.index_cast %c2_i32 : i32 to index
    %c0_50 = arith.constant 0 : index
    %c0_51 = arith.constant 0 : index
    %128 = vector.load %arg5[%127, %c0_50, %c0_51] : memref<4x2x32xf32, #tpu.memory_space<vmem>>, vector<1x2x32xf32>
    %129 = vector.shape_cast %128 : vector<1x2x32xf32> to vector<2x32xf32>
    %130 = vector.shape_cast %126 : vector<2x32xf32> to vector<1x2x32xf32>
    tpu.vector_store %arg5[%127, %c0_50, %c0_51], %130 {strides = array<i32>} : memref<4x2x32xf32, #tpu.memory_space<vmem>>, vector<1x2x32xf32>,
    %c3_i32 = arith.constant 3 : i32
    %131 = arith.index_cast %c3_i32 : i32 to index
    %c0_52 = arith.constant 0 : index
    %c0_53 = arith.constant 0 : index
    %132 = vector.load %arg1[%131, %c0_52, %c0_53] : memref<4x2x128xf32, #tpu.memory_space<vmem>>, vector<1x2x128xf32>
    %133 = vector.shape_cast %132 : vector<1x2x128xf32> to vector<2x128xf32>
    %134 = arith.truncf %126 : vector<2x32xf32> to vector<2x32xbf16>
    %c0_54 = arith.constant 0 : index
    %c0_55 = arith.constant 0 : index
    %135 = vector.load %arg4[%c0_54, %c0_55] : memref<32x128xbf16, #tpu.memory_space<vmem>>, vector<32x128xbf16>
    %cst_56 = arith.constant dense<0.000000e+00> : vector<2x128xf32>
    %136 = tpu.matmul %134, %135, %cst_56 {dimension_numbers = #tpu.dot_dimension_numbers<[1], [0], [0], [1], [0, 0, 1, 1], [], []>} : vector<2x32xbf16>, vector<32x128xbf16>, vector<2x128xf32> -> vector<2x128xf32>
    %137 = arith.addf %133, %136 : vector<2x128xf32>
    %138 = vector.extract_strided_slice %137 {offsets = [0, 0], sizes = [2, 32], strides = [1, 1]} : vector<2x128xf32> to vector<2x32xf32>
    %cst_57 = arith.constant 5.000000e-01 : f32
    %139 = vector.broadcast %cst_57 : f32 to vector<2x32xf32>
    %140 = arith.mulf %139, %138 : vector<2x32xf32>
    %141 = math.tanh %140 : vector<2x32xf32>
    %cst_58 = arith.constant 5.000000e-01 : f32
    %142 = vector.broadcast %cst_58 : f32 to vector<2x32xf32>
    %143 = arith.mulf %142, %141 : vector<2x32xf32>
    %cst_59 = arith.constant 5.000000e-01 : f32
    %144 = vector.broadcast %cst_59 : f32 to vector<2x32xf32>
    %145 = arith.addf %143, %144 : vector<2x32xf32>
    %146 = vector.extract_strided_slice %137 {offsets = [0, 32], sizes = [2, 32], strides = [1, 1]} : vector<2x128xf32> to vector<2x32xf32>
    %cst_60 = arith.constant 5.000000e-01 : f32
    %147 = vector.broadcast %cst_60 : f32 to vector<2x32xf32>
    %148 = arith.mulf %147, %146 : vector<2x32xf32>
    %149 = math.tanh %148 : vector<2x32xf32>
    %cst_61 = arith.constant 5.000000e-01 : f32
    %150 = vector.broadcast %cst_61 : f32 to vector<2x32xf32>
    %151 = arith.mulf %150, %149 : vector<2x32xf32>
    %cst_62 = arith.constant 5.000000e-01 : f32
    %152 = vector.broadcast %cst_62 : f32 to vector<2x32xf32>
    %153 = arith.addf %151, %152 : vector<2x32xf32>
    %154 = vector.extract_strided_slice %137 {offsets = [0, 64], sizes = [2, 32], strides = [1, 1]} : vector<2x128xf32> to vector<2x32xf32>
    %155 = math.tanh %154 : vector<2x32xf32>
    %156 = vector.extract_strided_slice %137 {offsets = [0, 96], sizes = [2, 32], strides = [1, 1]} : vector<2x128xf32> to vector<2x32xf32>
    %cst_63 = arith.constant 5.000000e-01 : f32
    %157 = vector.broadcast %cst_63 : f32 to vector<2x32xf32>
    %158 = arith.mulf %157, %156 : vector<2x32xf32>
    %159 = math.tanh %158 : vector<2x32xf32>
    %cst_64 = arith.constant 5.000000e-01 : f32
    %160 = vector.broadcast %cst_64 : f32 to vector<2x32xf32>
    %161 = arith.mulf %160, %159 : vector<2x32xf32>
    %cst_65 = arith.constant 5.000000e-01 : f32
    %162 = vector.broadcast %cst_65 : f32 to vector<2x32xf32>
    %163 = arith.addf %161, %162 : vector<2x32xf32>
    %164 = arith.mulf %153, %124 : vector<2x32xf32>
    %165 = arith.mulf %145, %155 : vector<2x32xf32>
    %166 = arith.addf %164, %165 : vector<2x32xf32>
    %167 = math.tanh %166 : vector<2x32xf32>
    %168 = arith.mulf %163, %167 : vector<2x32xf32>
    %169 = arith.index_cast %c3_i32 : i32 to index
    %c0_66 = arith.constant 0 : index
    %c0_67 = arith.constant 0 : index
    %170 = vector.load %arg5[%169, %c0_66, %c0_67] : memref<4x2x32xf32, #tpu.memory_space<vmem>>, vector<1x2x32xf32>
    %171 = vector.shape_cast %170 : vector<1x2x32xf32> to vector<2x32xf32>
    %172 = vector.shape_cast %168 : vector<2x32xf32> to vector<1x2x32xf32>
    tpu.vector_store %arg5[%169, %c0_66, %c0_67], %172 {strides = array<i32>} : memref<4x2x32xf32, #tpu.memory_space<vmem>>, vector<1x2x32xf32>,
    %c4_i32 = arith.constant 4 : i32
    %c0_68 = arith.constant 0 : index
    %c0_69 = arith.constant 0 : index
    %173 = vector.load %arg6[%c0_68, %c0_69] : memref<2x32xf32, #tpu.memory_space<vmem>>, vector<2x32xf32>
    tpu.vector_store %arg6[%c0_68, %c0_69], %168 {strides = array<i32>} : memref<2x32xf32, #tpu.memory_space<vmem>>, vector<2x32xf32>,
    %c0_70 = arith.constant 0 : index
    %c0_71 = arith.constant 0 : index
    %174 = vector.load %arg7[%c0_70, %c0_71] : memref<2x32xf32, #tpu.memory_space<vmem>>, vector<2x32xf32>
    tpu.vector_store %arg7[%c0_70, %c0_71], %166 {strides = array<i32>} : memref<2x32xf32, #tpu.memory_space<vmem>>, vector<2x32xf32>,
    return
  }
  func.func @transform_0(%arg0: i32) -> (i32, i32, i32) {
    %c0_i32 = arith.constant 0 : i32
    %c0_i32_0 = arith.constant 0 : i32
    %c0_i32_1 = arith.constant 0 : i32
    return %arg0, %c0_i32, %c0_i32_0 : i32, i32, i32
  }
  func.func @transform_1(%arg0: i32) -> (i32, i32) {
    %c0_i32 = arith.constant 0 : i32
    %c0_i32_0 = arith.constant 0 : i32
    %c0_i32_1 = arith.constant 0 : i32
    return %c0_i32, %c0_i32_0 : i32, i32
  }
  func.func @transform_2(%arg0: i32) -> (i32, i32) {
    %c0_i32 = arith.constant 0 : i32
    %c0_i32_0 = arith.constant 0 : i32
    %c0_i32_1 = arith.constant 0 : i32
    return %c0_i32, %c0_i32_0 : i32, i32
  }
  func.func @transform_3(%arg0: i32) -> (i32, i32) {
    %c0_i32 = arith.constant 0 : i32
    %c0_i32_0 = arith.constant 0 : i32
    %c0_i32_1 = arith.constant 0 : i32
    return %c0_i32, %c0_i32_0 : i32, i32
  }
  func.func @transform_4(%arg0: i32) -> (i32, i32, i32) {
    %c0_i32 = arith.constant 0 : i32
    %c0_i32_0 = arith.constant 0 : i32
    %c0_i32_1 = arith.constant 0 : i32
    return %arg0, %c0_i32, %c0_i32_0 : i32, i32, i32
  }
  func.func @transform_5(%arg0: i32) -> (i32, i32) {
    %c0_i32 = arith.constant 0 : i32
    %c0_i32_0 = arith.constant 0 : i32
    %c0_i32_1 = arith.constant 0 : i32
    return %c0_i32, %c0_i32_0 : i32, i32
  }
  func.func @transform_6(%arg0: i32) -> (i32, i32) {
    %c0_i32 = arith.constant 0 : i32
    %c0_i32_0 = arith.constant 0 : i32
    %c0_i32_1 = arith.constant 0 : i32
    return %c0_i32, %c0_i32_0 : i32, i32
  }
}

module attributes {stable_mosaic.version = 11 : i64} {
  func.func @_matmul_bias_kernel(%arg0: memref<16x32xf32, #tpu.memory_space<vmem>>, %arg1: memref<32x128xbf16, #tpu.memory_space<vmem>>, %arg2: memref<1x128xf32, #tpu.memory_space<vmem>>, %arg3: memref<16x128xf32, #tpu.memory_space<vmem>>) attributes {dimension_semantics = [], scalar_prefetch = 0 : i64, scratch_operands = 0 : i64, tpu.core_type = #tpu.core_type<tc>} {
    %c0 = arith.constant 0 : index
    %c0_0 = arith.constant 0 : index
    %0 = vector.load %arg0[%c0, %c0_0] : memref<16x32xf32, #tpu.memory_space<vmem>>, vector<16x32xf32>
    %1 = arith.truncf %0 : vector<16x32xf32> to vector<16x32xbf16>
    %c0_1 = arith.constant 0 : index
    %c0_2 = arith.constant 0 : index
    %2 = vector.load %arg1[%c0_1, %c0_2] : memref<32x128xbf16, #tpu.memory_space<vmem>>, vector<32x128xbf16>
    %cst = arith.constant dense<0.000000e+00> : vector<16x128xf32>
    %3 = tpu.matmul %1, %2, %cst {dimension_numbers = #tpu.dot_dimension_numbers<[1], [0], [0], [1], [0, 0, 1, 1], [], []>} : vector<16x32xbf16>, vector<32x128xbf16>, vector<16x128xf32> -> vector<16x128xf32>
    %c0_3 = arith.constant 0 : index
    %c0_4 = arith.constant 0 : index
    %4 = vector.load %arg2[%c0_3, %c0_4] : memref<1x128xf32, #tpu.memory_space<vmem>>, vector<1x128xf32>
    %5 = vector.broadcast %4 : vector<1x128xf32> to vector<16x128xf32>
    %6 = arith.addf %3, %5 : vector<16x128xf32>
    %c0_5 = arith.constant 0 : index
    %c0_6 = arith.constant 0 : index
    %7 = vector.load %arg3[%c0_5, %c0_6] : memref<16x128xf32, #tpu.memory_space<vmem>>, vector<16x128xf32>
    tpu.vector_store %arg3[%c0_5, %c0_6], %6 {strides = array<i32>} : memref<16x128xf32, #tpu.memory_space<vmem>>, vector<16x128xf32>,
    return
  }
}

module attributes {stable_mosaic.version = 11 : i64} {
  func.func @kernel(%arg0: i32, %arg1: memref<4x2x128xf32, #tpu.memory_space<vmem>>, %arg2: memref<2x32xf32, #tpu.memory_space<vmem>>, %arg3: memref<2x32xf32, #tpu.memory_space<vmem>>, %arg4: memref<32x128xbf16, #tpu.memory_space<vmem>>, %arg5: memref<32x128xbf16, #tpu.memory_space<vmem>>, %arg6: memref<1x128xf32, #tpu.memory_space<vmem>>, %arg7: memref<4x2x128xf32, #tpu.memory_space<vmem>>, %arg8: memref<2x32xf32, #tpu.memory_space<vmem>>, %arg9: memref<2x32xf32, #tpu.memory_space<vmem>>) attributes {dimension_semantics = [#tpu.dimension_semantics<arbitrary>], iteration_bounds = array<i64: 2>, scalar_prefetch = 0 : i64, scratch_operands = 0 : i64, tpu.core_type = #tpu.core_type<tc>, window_params = [{transform_indices = @transform_0, window_bounds = array<i64: 4, 2, 128>}, {pipeline_mode = #tpu.pipeline_mode<synchronous>, transform_indices = @transform_1, window_bounds = array<i64: 2, 32>}, {pipeline_mode = #tpu.pipeline_mode<synchronous>, transform_indices = @transform_2, window_bounds = array<i64: 2, 32>}, {pipeline_mode = #tpu.pipeline_mode<synchronous>, transform_indices = @transform_3, window_bounds = array<i64: 32, 128>}, {pipeline_mode = #tpu.pipeline_mode<synchronous>, transform_indices = @transform_4, window_bounds = array<i64: 32, 128>}, {pipeline_mode = #tpu.pipeline_mode<synchronous>, transform_indices = @transform_5, window_bounds = array<i64: 1, 128>}, {transform_indices = @transform_6, window_bounds = array<i64: 4, 2, 128>}, {pipeline_mode = #tpu.pipeline_mode<synchronous>, transform_indices = @transform_7, window_bounds = array<i64: 2, 32>}, {pipeline_mode = #tpu.pipeline_mode<synchronous>, transform_indices = @transform_8, window_bounds = array<i64: 2, 32>}]} {
    %c0_i32 = arith.constant 0 : i32
    %0 = arith.cmpi eq, %arg0, %c0_i32 : i32
    %1 = arith.extui %0 : i1 to i32
    %c0_i32_0 = arith.constant 0 : i32
    %2 = arith.cmpi ne, %1, %c0_i32_0 : i32
    scf.if %2 {
      %c0_92 = arith.constant 0 : index
      %c0_93 = arith.constant 0 : index
      %199 = vector.load %arg2[%c0_92, %c0_93] : memref<2x32xf32, #tpu.memory_space<vmem>>, vector<2x32xf32>
      %c0_94 = arith.constant 0 : index
      %c0_95 = arith.constant 0 : index
      %200 = vector.load %arg8[%c0_94, %c0_95] : memref<2x32xf32, #tpu.memory_space<vmem>>, vector<2x32xf32>
      tpu.vector_store %arg8[%c0_94, %c0_95], %199 {strides = array<i32>} : memref<2x32xf32, #tpu.memory_space<vmem>>, vector<2x32xf32>,
      %c0_96 = arith.constant 0 : index
      %c0_97 = arith.constant 0 : index
      %201 = vector.load %arg3[%c0_96, %c0_97] : memref<2x32xf32, #tpu.memory_space<vmem>>, vector<2x32xf32>
      %c0_98 = arith.constant 0 : index
      %c0_99 = arith.constant 0 : index
      %202 = vector.load %arg9[%c0_98, %c0_99] : memref<2x32xf32, #tpu.memory_space<vmem>>, vector<2x32xf32>
      tpu.vector_store %arg9[%c0_98, %c0_99], %201 {strides = array<i32>} : memref<2x32xf32, #tpu.memory_space<vmem>>, vector<2x32xf32>,
    } else {
    }
    %c0 = arith.constant 0 : index
    %c0_1 = arith.constant 0 : index
    %3 = vector.load %arg8[%c0, %c0_1] : memref<2x32xf32, #tpu.memory_space<vmem>>, vector<2x32xf32>
    %c0_2 = arith.constant 0 : index
    %c0_3 = arith.constant 0 : index
    %4 = vector.load %arg9[%c0_2, %c0_3] : memref<2x32xf32, #tpu.memory_space<vmem>>, vector<2x32xf32>
    %c0_i32_4 = arith.constant 0 : i32
    %5 = arith.index_cast %c0_i32_4 : i32 to index
    %c0_5 = arith.constant 0 : index
    %c0_6 = arith.constant 0 : index
    %6 = vector.load %arg1[%5, %c0_5, %c0_6] : memref<4x2x128xf32, #tpu.memory_space<vmem>>, vector<1x2x128xf32>
    %7 = vector.shape_cast %6 : vector<1x2x128xf32> to vector<2x128xf32>
    %8 = arith.truncf %3 : vector<2x32xf32> to vector<2x32xbf16>
    %c0_7 = arith.constant 0 : index
    %c0_8 = arith.constant 0 : index
    %9 = vector.load %arg4[%c0_7, %c0_8] : memref<32x128xbf16, #tpu.memory_space<vmem>>, vector<32x128xbf16>
    %cst = arith.constant dense<0.000000e+00> : vector<2x128xf32>
    %10 = tpu.matmul %8, %9, %cst {dimension_numbers = #tpu.dot_dimension_numbers<[1], [0], [0], [1], [0, 0, 1, 1], [], []>} : vector<2x32xbf16>, vector<32x128xbf16>, vector<2x128xf32> -> vector<2x128xf32>
    %11 = arith.addf %7, %10 : vector<2x128xf32>
    %12 = vector.extract_strided_slice %11 {offsets = [0, 0], sizes = [2, 32], strides = [1, 1]} : vector<2x128xf32> to vector<2x32xf32>
    %cst_9 = arith.constant 5.000000e-01 : f32
    %13 = vector.broadcast %cst_9 : f32 to vector<2x32xf32>
    %14 = arith.mulf %13, %12 : vector<2x32xf32>
    %15 = math.tanh %14 : vector<2x32xf32>
    %cst_10 = arith.constant 5.000000e-01 : f32
    %16 = vector.broadcast %cst_10 : f32 to vector<2x32xf32>
    %17 = arith.mulf %16, %15 : vector<2x32xf32>
    %cst_11 = arith.constant 5.000000e-01 : f32
    %18 = vector.broadcast %cst_11 : f32 to vector<2x32xf32>
    %19 = arith.addf %17, %18 : vector<2x32xf32>
    %20 = vector.extract_strided_slice %11 {offsets = [0, 32], sizes = [2, 32], strides = [1, 1]} : vector<2x128xf32> to vector<2x32xf32>
    %cst_12 = arith.constant 5.000000e-01 : f32
    %21 = vector.broadcast %cst_12 : f32 to vector<2x32xf32>
    %22 = arith.mulf %21, %20 : vector<2x32xf32>
    %23 = math.tanh %22 : vector<2x32xf32>
    %cst_13 = arith.constant 5.000000e-01 : f32
    %24 = vector.broadcast %cst_13 : f32 to vector<2x32xf32>
    %25 = arith.mulf %24, %23 : vector<2x32xf32>
    %cst_14 = arith.constant 5.000000e-01 : f32
    %26 = vector.broadcast %cst_14 : f32 to vector<2x32xf32>
    %27 = arith.addf %25, %26 : vector<2x32xf32>
    %28 = vector.extract_strided_slice %11 {offsets = [0, 64], sizes = [2, 32], strides = [1, 1]} : vector<2x128xf32> to vector<2x32xf32>
    %29 = math.tanh %28 : vector<2x32xf32>
    %30 = vector.extract_strided_slice %11 {offsets = [0, 96], sizes = [2, 32], strides = [1, 1]} : vector<2x128xf32> to vector<2x32xf32>
    %cst_15 = arith.constant 5.000000e-01 : f32
    %31 = vector.broadcast %cst_15 : f32 to vector<2x32xf32>
    %32 = arith.mulf %31, %30 : vector<2x32xf32>
    %33 = math.tanh %32 : vector<2x32xf32>
    %cst_16 = arith.constant 5.000000e-01 : f32
    %34 = vector.broadcast %cst_16 : f32 to vector<2x32xf32>
    %35 = arith.mulf %34, %33 : vector<2x32xf32>
    %cst_17 = arith.constant 5.000000e-01 : f32
    %36 = vector.broadcast %cst_17 : f32 to vector<2x32xf32>
    %37 = arith.addf %35, %36 : vector<2x32xf32>
    %38 = arith.mulf %27, %4 : vector<2x32xf32>
    %39 = arith.mulf %19, %29 : vector<2x32xf32>
    %40 = arith.addf %38, %39 : vector<2x32xf32>
    %41 = math.tanh %40 : vector<2x32xf32>
    %42 = arith.mulf %37, %41 : vector<2x32xf32>
    %43 = arith.truncf %42 : vector<2x32xf32> to vector<2x32xbf16>
    %c0_18 = arith.constant 0 : index
    %c0_19 = arith.constant 0 : index
    %44 = vector.load %arg5[%c0_18, %c0_19] : memref<32x128xbf16, #tpu.memory_space<vmem>>, vector<32x128xbf16>
    %cst_20 = arith.constant dense<0.000000e+00> : vector<2x128xf32>
    %45 = tpu.matmul %43, %44, %cst_20 {dimension_numbers = #tpu.dot_dimension_numbers<[1], [0], [0], [1], [0, 0, 1, 1], [], []>} : vector<2x32xbf16>, vector<32x128xbf16>, vector<2x128xf32> -> vector<2x128xf32>
    %c0_21 = arith.constant 0 : index
    %c0_22 = arith.constant 0 : index
    %46 = vector.load %arg6[%c0_21, %c0_22] : memref<1x128xf32, #tpu.memory_space<vmem>>, vector<1x128xf32>
    %47 = vector.broadcast %46 : vector<1x128xf32> to vector<2x128xf32>
    %48 = arith.addf %45, %47 : vector<2x128xf32>
    %49 = arith.index_cast %c0_i32_4 : i32 to index
    %c0_23 = arith.constant 0 : index
    %c0_24 = arith.constant 0 : index
    %50 = vector.load %arg7[%49, %c0_23, %c0_24] : memref<4x2x128xf32, #tpu.memory_space<vmem>>, vector<1x2x128xf32>
    %51 = vector.shape_cast %50 : vector<1x2x128xf32> to vector<2x128xf32>
    %52 = vector.shape_cast %48 : vector<2x128xf32> to vector<1x2x128xf32>
    tpu.vector_store %arg7[%49, %c0_23, %c0_24], %52 {strides = array<i32>} : memref<4x2x128xf32, #tpu.memory_space<vmem>>, vector<1x2x128xf32>,
    %c1_i32 = arith.constant 1 : i32
    %53 = arith.index_cast %c1_i32 : i32 to index
    %c0_25 = arith.constant 0 : index
    %c0_26 = arith.constant 0 : index
    %54 = vector.load %arg1[%53, %c0_25, %c0_26] : memref<4x2x128xf32, #tpu.memory_space<vmem>>, vector<1x2x128xf32>
    %55 = vector.shape_cast %54 : vector<1x2x128xf32> to vector<2x128xf32>
    %56 = arith.truncf %42 : vector<2x32xf32> to vector<2x32xbf16>
    %c0_27 = arith.constant 0 : index
    %c0_28 = arith.constant 0 : index
    %57 = vector.load %arg4[%c0_27, %c0_28] : memref<32x128xbf16, #tpu.memory_space<vmem>>, vector<32x128xbf16>
    %cst_29 = arith.constant dense<0.000000e+00> : vector<2x128xf32>
    %58 = tpu.matmul %56, %57, %cst_29 {dimension_numbers = #tpu.dot_dimension_numbers<[1], [0], [0], [1], [0, 0, 1, 1], [], []>} : vector<2x32xbf16>, vector<32x128xbf16>, vector<2x128xf32> -> vector<2x128xf32>
    %59 = arith.addf %55, %58 : vector<2x128xf32>
    %60 = vector.extract_strided_slice %59 {offsets = [0, 0], sizes = [2, 32], strides = [1, 1]} : vector<2x128xf32> to vector<2x32xf32>
    %cst_30 = arith.constant 5.000000e-01 : f32
    %61 = vector.broadcast %cst_30 : f32 to vector<2x32xf32>
    %62 = arith.mulf %61, %60 : vector<2x32xf32>
    %63 = math.tanh %62 : vector<2x32xf32>
    %cst_31 = arith.constant 5.000000e-01 : f32
    %64 = vector.broadcast %cst_31 : f32 to vector<2x32xf32>
    %65 = arith.mulf %64, %63 : vector<2x32xf32>
    %cst_32 = arith.constant 5.000000e-01 : f32
    %66 = vector.broadcast %cst_32 : f32 to vector<2x32xf32>
    %67 = arith.addf %65, %66 : vector<2x32xf32>
    %68 = vector.extract_strided_slice %59 {offsets = [0, 32], sizes = [2, 32], strides = [1, 1]} : vector<2x128xf32> to vector<2x32xf32>
    %cst_33 = arith.constant 5.000000e-01 : f32
    %69 = vector.broadcast %cst_33 : f32 to vector<2x32xf32>
    %70 = arith.mulf %69, %68 : vector<2x32xf32>
    %71 = math.tanh %70 : vector<2x32xf32>
    %cst_34 = arith.constant 5.000000e-01 : f32
    %72 = vector.broadcast %cst_34 : f32 to vector<2x32xf32>
    %73 = arith.mulf %72, %71 : vector<2x32xf32>
    %cst_35 = arith.constant 5.000000e-01 : f32
    %74 = vector.broadcast %cst_35 : f32 to vector<2x32xf32>
    %75 = arith.addf %73, %74 : vector<2x32xf32>
    %76 = vector.extract_strided_slice %59 {offsets = [0, 64], sizes = [2, 32], strides = [1, 1]} : vector<2x128xf32> to vector<2x32xf32>
    %77 = math.tanh %76 : vector<2x32xf32>
    %78 = vector.extract_strided_slice %59 {offsets = [0, 96], sizes = [2, 32], strides = [1, 1]} : vector<2x128xf32> to vector<2x32xf32>
    %cst_36 = arith.constant 5.000000e-01 : f32
    %79 = vector.broadcast %cst_36 : f32 to vector<2x32xf32>
    %80 = arith.mulf %79, %78 : vector<2x32xf32>
    %81 = math.tanh %80 : vector<2x32xf32>
    %cst_37 = arith.constant 5.000000e-01 : f32
    %82 = vector.broadcast %cst_37 : f32 to vector<2x32xf32>
    %83 = arith.mulf %82, %81 : vector<2x32xf32>
    %cst_38 = arith.constant 5.000000e-01 : f32
    %84 = vector.broadcast %cst_38 : f32 to vector<2x32xf32>
    %85 = arith.addf %83, %84 : vector<2x32xf32>
    %86 = arith.mulf %75, %40 : vector<2x32xf32>
    %87 = arith.mulf %67, %77 : vector<2x32xf32>
    %88 = arith.addf %86, %87 : vector<2x32xf32>
    %89 = math.tanh %88 : vector<2x32xf32>
    %90 = arith.mulf %85, %89 : vector<2x32xf32>
    %91 = arith.truncf %90 : vector<2x32xf32> to vector<2x32xbf16>
    %c0_39 = arith.constant 0 : index
    %c0_40 = arith.constant 0 : index
    %92 = vector.load %arg5[%c0_39, %c0_40] : memref<32x128xbf16, #tpu.memory_space<vmem>>, vector<32x128xbf16>
    %cst_41 = arith.constant dense<0.000000e+00> : vector<2x128xf32>
    %93 = tpu.matmul %91, %92, %cst_41 {dimension_numbers = #tpu.dot_dimension_numbers<[1], [0], [0], [1], [0, 0, 1, 1], [], []>} : vector<2x32xbf16>, vector<32x128xbf16>, vector<2x128xf32> -> vector<2x128xf32>
    %c0_42 = arith.constant 0 : index
    %c0_43 = arith.constant 0 : index
    %94 = vector.load %arg6[%c0_42, %c0_43] : memref<1x128xf32, #tpu.memory_space<vmem>>, vector<1x128xf32>
    %95 = vector.broadcast %94 : vector<1x128xf32> to vector<2x128xf32>
    %96 = arith.addf %93, %95 : vector<2x128xf32>
    %97 = arith.index_cast %c1_i32 : i32 to index
    %c0_44 = arith.constant 0 : index
    %c0_45 = arith.constant 0 : index
    %98 = vector.load %arg7[%97, %c0_44, %c0_45] : memref<4x2x128xf32, #tpu.memory_space<vmem>>, vector<1x2x128xf32>
    %99 = vector.shape_cast %98 : vector<1x2x128xf32> to vector<2x128xf32>
    %100 = vector.shape_cast %96 : vector<2x128xf32> to vector<1x2x128xf32>
    tpu.vector_store %arg7[%97, %c0_44, %c0_45], %100 {strides = array<i32>} : memref<4x2x128xf32, #tpu.memory_space<vmem>>, vector<1x2x128xf32>,
    %c2_i32 = arith.constant 2 : i32
    %101 = arith.index_cast %c2_i32 : i32 to index
    %c0_46 = arith.constant 0 : index
    %c0_47 = arith.constant 0 : index
    %102 = vector.load %arg1[%101, %c0_46, %c0_47] : memref<4x2x128xf32, #tpu.memory_space<vmem>>, vector<1x2x128xf32>
    %103 = vector.shape_cast %102 : vector<1x2x128xf32> to vector<2x128xf32>
    %104 = arith.truncf %90 : vector<2x32xf32> to vector<2x32xbf16>
    %c0_48 = arith.constant 0 : index
    %c0_49 = arith.constant 0 : index
    %105 = vector.load %arg4[%c0_48, %c0_49] : memref<32x128xbf16, #tpu.memory_space<vmem>>, vector<32x128xbf16>
    %cst_50 = arith.constant dense<0.000000e+00> : vector<2x128xf32>
    %106 = tpu.matmul %104, %105, %cst_50 {dimension_numbers = #tpu.dot_dimension_numbers<[1], [0], [0], [1], [0, 0, 1, 1], [], []>} : vector<2x32xbf16>, vector<32x128xbf16>, vector<2x128xf32> -> vector<2x128xf32>
    %107 = arith.addf %103, %106 : vector<2x128xf32>
    %108 = vector.extract_strided_slice %107 {offsets = [0, 0], sizes = [2, 32], strides = [1, 1]} : vector<2x128xf32> to vector<2x32xf32>
    %cst_51 = arith.constant 5.000000e-01 : f32
    %109 = vector.broadcast %cst_51 : f32 to vector<2x32xf32>
    %110 = arith.mulf %109, %108 : vector<2x32xf32>
    %111 = math.tanh %110 : vector<2x32xf32>
    %cst_52 = arith.constant 5.000000e-01 : f32
    %112 = vector.broadcast %cst_52 : f32 to vector<2x32xf32>
    %113 = arith.mulf %112, %111 : vector<2x32xf32>
    %cst_53 = arith.constant 5.000000e-01 : f32
    %114 = vector.broadcast %cst_53 : f32 to vector<2x32xf32>
    %115 = arith.addf %113, %114 : vector<2x32xf32>
    %116 = vector.extract_strided_slice %107 {offsets = [0, 32], sizes = [2, 32], strides = [1, 1]} : vector<2x128xf32> to vector<2x32xf32>
    %cst_54 = arith.constant 5.000000e-01 : f32
    %117 = vector.broadcast %cst_54 : f32 to vector<2x32xf32>
    %118 = arith.mulf %117, %116 : vector<2x32xf32>
    %119 = math.tanh %118 : vector<2x32xf32>
    %cst_55 = arith.constant 5.000000e-01 : f32
    %120 = vector.broadcast %cst_55 : f32 to vector<2x32xf32>
    %121 = arith.mulf %120, %119 : vector<2x32xf32>
    %cst_56 = arith.constant 5.000000e-01 : f32
    %122 = vector.broadcast %cst_56 : f32 to vector<2x32xf32>
    %123 = arith.addf %121, %122 : vector<2x32xf32>
    %124 = vector.extract_strided_slice %107 {offsets = [0, 64], sizes = [2, 32], strides = [1, 1]} : vector<2x128xf32> to vector<2x32xf32>
    %125 = math.tanh %124 : vector<2x32xf32>
    %126 = vector.extract_strided_slice %107 {offsets = [0, 96], sizes = [2, 32], strides = [1, 1]} : vector<2x128xf32> to vector<2x32xf32>
    %cst_57 = arith.constant 5.000000e-01 : f32
    %127 = vector.broadcast %cst_57 : f32 to vector<2x32xf32>
    %128 = arith.mulf %127, %126 : vector<2x32xf32>
    %129 = math.tanh %128 : vector<2x32xf32>
    %cst_58 = arith.constant 5.000000e-01 : f32
    %130 = vector.broadcast %cst_58 : f32 to vector<2x32xf32>
    %131 = arith.mulf %130, %129 : vector<2x32xf32>
    %cst_59 = arith.constant 5.000000e-01 : f32
    %132 = vector.broadcast %cst_59 : f32 to vector<2x32xf32>
    %133 = arith.addf %131, %132 : vector<2x32xf32>
    %134 = arith.mulf %123, %88 : vector<2x32xf32>
    %135 = arith.mulf %115, %125 : vector<2x32xf32>
    %136 = arith.addf %134, %135 : vector<2x32xf32>
    %137 = math.tanh %136 : vector<2x32xf32>
    %138 = arith.mulf %133, %137 : vector<2x32xf32>
    %139 = arith.truncf %138 : vector<2x32xf32> to vector<2x32xbf16>
    %c0_60 = arith.constant 0 : index
    %c0_61 = arith.constant 0 : index
    %140 = vector.load %arg5[%c0_60, %c0_61] : memref<32x128xbf16, #tpu.memory_space<vmem>>, vector<32x128xbf16>
    %cst_62 = arith.constant dense<0.000000e+00> : vector<2x128xf32>
    %141 = tpu.matmul %139, %140, %cst_62 {dimension_numbers = #tpu.dot_dimension_numbers<[1], [0], [0], [1], [0, 0, 1, 1], [], []>} : vector<2x32xbf16>, vector<32x128xbf16>, vector<2x128xf32> -> vector<2x128xf32>
    %c0_63 = arith.constant 0 : index
    %c0_64 = arith.constant 0 : index
    %142 = vector.load %arg6[%c0_63, %c0_64] : memref<1x128xf32, #tpu.memory_space<vmem>>, vector<1x128xf32>
    %143 = vector.broadcast %142 : vector<1x128xf32> to vector<2x128xf32>
    %144 = arith.addf %141, %143 : vector<2x128xf32>
    %145 = arith.index_cast %c2_i32 : i32 to index
    %c0_65 = arith.constant 0 : index
    %c0_66 = arith.constant 0 : index
    %146 = vector.load %arg7[%145, %c0_65, %c0_66] : memref<4x2x128xf32, #tpu.memory_space<vmem>>, vector<1x2x128xf32>
    %147 = vector.shape_cast %146 : vector<1x2x128xf32> to vector<2x128xf32>
    %148 = vector.shape_cast %144 : vector<2x128xf32> to vector<1x2x128xf32>
    tpu.vector_store %arg7[%145, %c0_65, %c0_66], %148 {strides = array<i32>} : memref<4x2x128xf32, #tpu.memory_space<vmem>>, vector<1x2x128xf32>,
    %c3_i32 = arith.constant 3 : i32
    %149 = arith.index_cast %c3_i32 : i32 to index
    %c0_67 = arith.constant 0 : index
    %c0_68 = arith.constant 0 : index
    %150 = vector.load %arg1[%149, %c0_67, %c0_68] : memref<4x2x128xf32, #tpu.memory_space<vmem>>, vector<1x2x128xf32>
    %151 = vector.shape_cast %150 : vector<1x2x128xf32> to vector<2x128xf32>
    %152 = arith.truncf %138 : vector<2x32xf32> to vector<2x32xbf16>
    %c0_69 = arith.constant 0 : index
    %c0_70 = arith.constant 0 : index
    %153 = vector.load %arg4[%c0_69, %c0_70] : memref<32x128xbf16, #tpu.memory_space<vmem>>, vector<32x128xbf16>
    %cst_71 = arith.constant dense<0.000000e+00> : vector<2x128xf32>
    %154 = tpu.matmul %152, %153, %cst_71 {dimension_numbers = #tpu.dot_dimension_numbers<[1], [0], [0], [1], [0, 0, 1, 1], [], []>} : vector<2x32xbf16>, vector<32x128xbf16>, vector<2x128xf32> -> vector<2x128xf32>
    %155 = arith.addf %151, %154 : vector<2x128xf32>
    %156 = vector.extract_strided_slice %155 {offsets = [0, 0], sizes = [2, 32], strides = [1, 1]} : vector<2x128xf32> to vector<2x32xf32>
    %cst_72 = arith.constant 5.000000e-01 : f32
    %157 = vector.broadcast %cst_72 : f32 to vector<2x32xf32>
    %158 = arith.mulf %157, %156 : vector<2x32xf32>
    %159 = math.tanh %158 : vector<2x32xf32>
    %cst_73 = arith.constant 5.000000e-01 : f32
    %160 = vector.broadcast %cst_73 : f32 to vector<2x32xf32>
    %161 = arith.mulf %160, %159 : vector<2x32xf32>
    %cst_74 = arith.constant 5.000000e-01 : f32
    %162 = vector.broadcast %cst_74 : f32 to vector<2x32xf32>
    %163 = arith.addf %161, %162 : vector<2x32xf32>
    %164 = vector.extract_strided_slice %155 {offsets = [0, 32], sizes = [2, 32], strides = [1, 1]} : vector<2x128xf32> to vector<2x32xf32>
    %cst_75 = arith.constant 5.000000e-01 : f32
    %165 = vector.broadcast %cst_75 : f32 to vector<2x32xf32>
    %166 = arith.mulf %165, %164 : vector<2x32xf32>
    %167 = math.tanh %166 : vector<2x32xf32>
    %cst_76 = arith.constant 5.000000e-01 : f32
    %168 = vector.broadcast %cst_76 : f32 to vector<2x32xf32>
    %169 = arith.mulf %168, %167 : vector<2x32xf32>
    %cst_77 = arith.constant 5.000000e-01 : f32
    %170 = vector.broadcast %cst_77 : f32 to vector<2x32xf32>
    %171 = arith.addf %169, %170 : vector<2x32xf32>
    %172 = vector.extract_strided_slice %155 {offsets = [0, 64], sizes = [2, 32], strides = [1, 1]} : vector<2x128xf32> to vector<2x32xf32>
    %173 = math.tanh %172 : vector<2x32xf32>
    %174 = vector.extract_strided_slice %155 {offsets = [0, 96], sizes = [2, 32], strides = [1, 1]} : vector<2x128xf32> to vector<2x32xf32>
    %cst_78 = arith.constant 5.000000e-01 : f32
    %175 = vector.broadcast %cst_78 : f32 to vector<2x32xf32>
    %176 = arith.mulf %175, %174 : vector<2x32xf32>
    %177 = math.tanh %176 : vector<2x32xf32>
    %cst_79 = arith.constant 5.000000e-01 : f32
    %178 = vector.broadcast %cst_79 : f32 to vector<2x32xf32>
    %179 = arith.mulf %178, %177 : vector<2x32xf32>
    %cst_80 = arith.constant 5.000000e-01 : f32
    %180 = vector.broadcast %cst_80 : f32 to vector<2x32xf32>
    %181 = arith.addf %179, %180 : vector<2x32xf32>
    %182 = arith.mulf %171, %136 : vector<2x32xf32>
    %183 = arith.mulf %163, %173 : vector<2x32xf32>
    %184 = arith.addf %182, %183 : vector<2x32xf32>
    %185 = math.tanh %184 : vector<2x32xf32>
    %186 = arith.mulf %181, %185 : vector<2x32xf32>
    %187 = arith.truncf %186 : vector<2x32xf32> to vector<2x32xbf16>
    %c0_81 = arith.constant 0 : index
    %c0_82 = arith.constant 0 : index
    %188 = vector.load %arg5[%c0_81, %c0_82] : memref<32x128xbf16, #tpu.memory_space<vmem>>, vector<32x128xbf16>
    %cst_83 = arith.constant dense<0.000000e+00> : vector<2x128xf32>
    %189 = tpu.matmul %187, %188, %cst_83 {dimension_numbers = #tpu.dot_dimension_numbers<[1], [0], [0], [1], [0, 0, 1, 1], [], []>} : vector<2x32xbf16>, vector<32x128xbf16>, vector<2x128xf32> -> vector<2x128xf32>
    %c0_84 = arith.constant 0 : index
    %c0_85 = arith.constant 0 : index
    %190 = vector.load %arg6[%c0_84, %c0_85] : memref<1x128xf32, #tpu.memory_space<vmem>>, vector<1x128xf32>
    %191 = vector.broadcast %190 : vector<1x128xf32> to vector<2x128xf32>
    %192 = arith.addf %189, %191 : vector<2x128xf32>
    %193 = arith.index_cast %c3_i32 : i32 to index
    %c0_86 = arith.constant 0 : index
    %c0_87 = arith.constant 0 : index
    %194 = vector.load %arg7[%193, %c0_86, %c0_87] : memref<4x2x128xf32, #tpu.memory_space<vmem>>, vector<1x2x128xf32>
    %195 = vector.shape_cast %194 : vector<1x2x128xf32> to vector<2x128xf32>
    %196 = vector.shape_cast %192 : vector<2x128xf32> to vector<1x2x128xf32>
    tpu.vector_store %arg7[%193, %c0_86, %c0_87], %196 {strides = array<i32>} : memref<4x2x128xf32, #tpu.memory_space<vmem>>, vector<1x2x128xf32>,
    %c4_i32 = arith.constant 4 : i32
    %c0_88 = arith.constant 0 : index
    %c0_89 = arith.constant 0 : index
    %197 = vector.load %arg8[%c0_88, %c0_89] : memref<2x32xf32, #tpu.memory_space<vmem>>, vector<2x32xf32>
    tpu.vector_store %arg8[%c0_88, %c0_89], %186 {strides = array<i32>} : memref<2x32xf32, #tpu.memory_space<vmem>>, vector<2x32xf32>,
    %c0_90 = arith.constant 0 : index
    %c0_91 = arith.constant 0 : index
    %198 = vector.load %arg9[%c0_90, %c0_91] : memref<2x32xf32, #tpu.memory_space<vmem>>, vector<2x32xf32>
    tpu.vector_store %arg9[%c0_90, %c0_91], %184 {strides = array<i32>} : memref<2x32xf32, #tpu.memory_space<vmem>>, vector<2x32xf32>,
    return
  }
  func.func @transform_0(%arg0: i32) -> (i32, i32, i32) {
    %c0_i32 = arith.constant 0 : i32
    %c0_i32_0 = arith.constant 0 : i32
    %c0_i32_1 = arith.constant 0 : i32
    return %arg0, %c0_i32, %c0_i32_0 : i32, i32, i32
  }
  func.func @transform_1(%arg0: i32) -> (i32, i32) {
    %c0_i32 = arith.constant 0 : i32
    %c0_i32_0 = arith.constant 0 : i32
    %c0_i32_1 = arith.constant 0 : i32
    return %c0_i32, %c0_i32_0 : i32, i32
  }
  func.func @transform_2(%arg0: i32) -> (i32, i32) {
    %c0_i32 = arith.constant 0 : i32
    %c0_i32_0 = arith.constant 0 : i32
    %c0_i32_1 = arith.constant 0 : i32
    return %c0_i32, %c0_i32_0 : i32, i32
  }
  func.func @transform_3(%arg0: i32) -> (i32, i32) {
    %c0_i32 = arith.constant 0 : i32
    %c0_i32_0 = arith.constant 0 : i32
    %c0_i32_1 = arith.constant 0 : i32
    return %c0_i32, %c0_i32_0 : i32, i32
  }
  func.func @transform_4(%arg0: i32) -> (i32, i32) {
    %c0_i32 = arith.constant 0 : i32
    %c0_i32_0 = arith.constant 0 : i32
    %c0_i32_1 = arith.constant 0 : i32
    return %c0_i32, %c0_i32_0 : i32, i32
  }
  func.func @transform_5(%arg0: i32) -> (i32, i32) {
    %c0_i32 = arith.constant 0 : i32
    %c0_i32_0 = arith.constant 0 : i32
    %c0_i32_1 = arith.constant 0 : i32
    return %c0_i32, %c0_i32_0 : i32, i32
  }
  func.func @transform_6(%arg0: i32) -> (i32, i32, i32) {
    %c0_i32 = arith.constant 0 : i32
    %c0_i32_0 = arith.constant 0 : i32
    %c0_i32_1 = arith.constant 0 : i32
    return %arg0, %c0_i32, %c0_i32_0 : i32, i32, i32
  }
  func.func @transform_7(%arg0: i32) -> (i32, i32) {
    %c0_i32 = arith.constant 0 : i32
    %c0_i32_0 = arith.constant 0 : i32
    %c0_i32_1 = arith.constant 0 : i32
    return %c0_i32, %c0_i32_0 : i32, i32
  }
  func.func @transform_8(%arg0: i32) -> (i32, i32) {
    %c0_i32 = arith.constant 0 : i32
    %c0_i32_0 = arith.constant 0 : i32
    %c0_i32_1 = arith.constant 0 : i32
    return %c0_i32, %c0_i32_0 : i32, i32
  }
}

</mosaic_0001>

<bundles_post_ra>
// kernel: vanilla_lstm_forward.6
= control target key start
LH: loop header
LB: loop body
LE: loop exit
PB: predicated region body
PF: predicated region fallthrough
CT: control target
= control target key end

     0   :  { %v111_v0 = vmov 0.0   ;;  %vm112_vm0 = vmmov 0   ;;  %vm41_vm1 = vcmask 261120   ;;  %s154_s1 = inlined_call_operand.vmem [shape: bf16[32,128], index: 1, kind: input, shape index: {}]   ;;  %s155_s0 = inlined_call_operand.vmem [shape: f32[16,32], index: 0, kind: input, shape index: {}]   ;;  %s156_s2 = inlined_call_operand.vmem [shape: f32[1,128], index: 2, kind: input, shape index: {}]   ;;  %s157_s3 = inlined_call_operand.vmem [shape: f32[16,128], index: 3, kind: output, shape index: {}]  }
   0x1   :  { %99 = vmatprep.subr.bf16.mxu0 %v111_v0  ;;  %v109_v1 = vld [vmem:[%s154_s1 + $0x8] sm:$0xff]   ;;  %103 = vmatprep.mubr.msk.bf16.mxu0 %vm112_vm0, %v111_v0  ;;  %v110_v2 = vld [vmem:[%s154_s1] sm:$0xff]  }
   0x2   :  { %100 = vmatpush3.bf16.msra.mxu0 %v109_v1  ;;  %v15_v3 = vld [vmem:[%s155_s0] sm:$0xff]  ;;  %v16_v4 = vld [vmem:[%s155_s0 + $0x8] sm:$0xff] }
   0x3   :  { %101 = vmatprep.subr.bf16.mxu0 %v111_v0  ;;  %v17_v5 = vpack.c.bf16 %v16_v4, %v15_v3  ;;  %v92_v6 = vld [vmem:[%s156_s2] ss:$0 sm:$0xff] }
   0x6   :  { %102 = vmatpush3.bf16.msra.mxu0 %v110_v2 }
   0x9   :  { %104 = vmatmul.mubr.msk.bf16.vlgmr.msra.gmra.mxu0 %vm41_vm1, %v17_v5 }
  0xc9   :  { %v79_v7 = vpop.f32.mrf.mxu0 }
  0xca   :  { %v80_v8 = vadd.f32 %v92_v6, %v79_v7 }
  0xcb   :  { %v105_v9 = vpop.f32.mrf.mxu0 }
  0xcc   :  { %86 = vst [vmem:[%s157_s3] sm:$0xff] %v80_v8 }
  0xcd   :  { %v82_v10 = vpop.f32.mrf.mxu0 }
  0xce   :  { %v83_v11 = vadd.f32 %v92_v6, %v82_v10 }
  0xcf   :  { %v106_v12 = vpop.f32.mrf.mxu0 }
  0xd0   :  { %87 = vst [vmem:[%s157_s3 + $0x8] sm:$0xff] %v83_v11 }

// kernel: vanilla_lstm_forward.4
= control target key start
LH: loop header
LB: loop body
LE: loop exit
PB: predicated region body
PF: predicated region fallthrough
CT: control target
= control target key end

     0   :  { %vm30_vm0 = vcmask 1041408   ;;  %v93_v0 = vmov 0.0   ;;  %vm94_vm1 = vmmov 0   ;;  %vm26_vm2 = vcmask 31744   ;;  %s133_s1 = inlined_call_operand.vmem [shape: bf16[4,128], index: 1, kind: input, shape index: {}]   ;;  %s134_s0 = inlined_call_operand.vmem [shape: f32[16,4], index: 0, kind: input, shape index: {}]   ;;  %s135_s2 = inlined_call_operand.vmem [shape: f32[1,128], index: 2, kind: input, shape index: {}]   ;;  %s136_s3 = inlined_call_operand.vmem [shape: f32[16,128], index: 3, kind: output, shape index: {}]  }
   0x1   :  { %85 = vmatprep.subr.bf16.mxu0 %v93_v0  ;;  %v18_v1 = vld [vmem:[%s133_s1] sm:$0x3]  ;;  %87 = vmatprep.mubr.msk.bf16.mxu0 %vm94_vm1, %v93_v0  ;;  %v16_v3 = vld [vmem:[%s134_s0 + $0x8] sm:$0xff] }
   0x2   :  { %v15_v2 = vld [vmem:[%s134_s0] sm:$0xff]  ;;  %v32_v4 = vsel %vm30_vm0, %v18_v1, 0 }
   0x3   :  { %v17_v5 = vpack.c.bf16 %v16_v3, %v15_v2  ;;  %86 = vmatpush3.bf16.msra.mxu0 %v32_v4  ;;  %v81_v6 = vld [vmem:[%s135_s2] ss:$0 sm:$0xff] }
   0x6   :  { %88 = vmatmul.mubr.msk.bf16.vlgmr.msra.gmra.mxu0 %vm26_vm2, %v17_v5 }
  0xc6   :  { %v68_v7 = vpop.f32.mrf.mxu0 }
  0xc7   :  { %v69_v8 = vadd.f32 %v81_v6, %v68_v7 }
  0xc8   :  { %v89_v9 = vpop.f32.mrf.mxu0 }
  0xc9   :  { %75 = vst [vmem:[%s136_s3] sm:$0xff] %v69_v8 }
  0xca   :  { %v71_v10 = vpop.f32.mrf.mxu0 }
  0xcb   :  { %v72_v11 = vadd.f32 %v81_v6, %v71_v10 }
  0xcc   :  { %v90_v12 = vpop.f32.mrf.mxu0 }
  0xcd   :  { %76 = vst [vmem:[%s136_s3 + $0x8] sm:$0xff] %v72_v11 }

// kernel: vanilla_lstm_forward.5
= control target key start
LH: loop header
LB: loop body
LE: loop exit
PB: predicated region body
PF: predicated region fallthrough
CT: control target
= control target key end

     0   :  { %s880_s21 = smov 0   ;;  %s1013_s0 = inlined_call_operand.vmem [shape: f32[8,2,128], index: 0, kind: input, shape index: {}]   ;;  %s1014_s1 = inlined_call_operand.vmem [shape: f32[2,32], index: 1, kind: input, shape index: {}]   ;;  %s1015_s2 = inlined_call_operand.vmem [shape: f32[2,32], index: 2, kind: input, shape index: {}]   ;;  %s1016_s3 = inlined_call_operand.vmem [shape: bf16[32,128], index: 3, kind: input, shape index: {}]   ;;  %s1017_s4 = inlined_call_operand.vmem [shape: f32[8,2,32], index: 4, kind: output, shape index: {0}]   ;;  %s1018_s5 = inlined_call_operand.vmem [shape: f32[2,32], index: 5, kind: output, shape index: {1}]   ;;  %s1019_s6 = inlined_call_operand.vmem [shape: f32[2,32], index: 6, kind: output, shape index: {2}]  }
   0x1 LB: > { %s713_s22 = sadd.s32 4294967295, %s838_s21   ;;  %p717_p0 = scmp.ge.s32.totalorder %s838_s21, 1  ;;  %s838_s21 = sphi %s880_s21, %s17_s21  }
   0x2   : > { %p208_p1 = scmp.lt.s32.totalorder %s838_s21, 3 }
   0x4   : > { %p209_p2 = pnand %p717_p0, %p208_p1 }
   0x5   : > { %s718_s23 = sshll.u32 (!%p209_p2), %s713_s22, 2  ;;  %p722_p4 = scmp.ne.s32.totalorder (!%p209_p2), %s713_s22, 0 }
   0x6   : > { %212 = sbr.rel (%p209_p2) target bundleno = 2791 (0xae7), region = 36  ;;  %p239_p3 = scmp.lt.s32.totalorder (!%p209_p2), %s718_s23, 7 }
   0xb   : > { %s1021_s23 = smov (!%p239_p3, %s718_s23), 7  ;;  %254 = sbr.rel (%p722_p4) target bundleno = 19 (0x13), region = 40 }
   0xc   : > { %s719_s24 = sshll.u32 %s1021_s23, 1 }
   0xd   : > { %s891_s27 = scalar_lea.vmem %s1013_s0, %s719_s24  ;;  %s896_s30 = scalar_lea.vmem %s1017_s4, %s719_s24 }
  0x10   : > { %v255_v0 = vld [vmem:[%s1014_s1] sm:$0x3]  ;;  %vm256_vm0 = vcmask 254976  }
  0x11   : > { %v258_v1 = vld [vmem:[%s1015_s2] sm:$0x3]  ;;  %257 = vst.msk [vmem:[%s1018_s5] sm:$0x3] %vm256_vm0, %v255_v0 }
  0x12   : > { %259 = vst.msk [vmem:[%s1019_s6] sm:$0x3] %vm256_vm0, %v258_v1 }
  0x13 PF: > { %v800_v2 = vld [vmem:[%s1016_s3 + $0x8] sm:$0xff]   ;;  %v840_v3 = vmov 0.0   ;;  %v801_v4 = vld [vmem:[%s1016_s3] sm:$0xff]   ;;  %vm841_vm1 = vmmov 0   ;;  %vm280_vm2 = vcmask 261120   ;;  %s842_s22 = smov 64  }
  0x14   : > { %755 = vmatprep.subr.bf16.mxu0 %v840_v3  ;;  %763 = vmatprep.subr.bf16.mxu1 %v840_v3  ;;  %v262_v7 = vld [vmem:[%s891_s27] sm:$0x3]  ;;  %s843_s25 = smov 32   ;;  %v802_v25 = vld [vmem:[%s1016_s3 + $0x8] sm:$0xff]   ;;  %v726_v32 = vld [vmem:[%s891_s27 + $0x2] sm:$0x3] }
  0x15   : > { %756 = vmatpush3.bf16.msra.mxu0 %v800_v2  ;;  %759 = vmatprep.mubr.msk.bf16.mxu0 %vm841_vm1, %v840_v3  ;;  %v803_v26 = vld [vmem:[%s1016_s3] sm:$0xff]   ;;  %v804_v48 = vld [vmem:[%s1016_s3 + $0x8] sm:$0xff]   ;;  %vm355_vm3 = vcmask 254976  }
  0x16   : > { %757 = vmatprep.subr.bf16.mxu0 %v840_v3  ;;  %767 = vmatprep.mubr.msk.bf16.mxu1 %vm841_vm1, %v840_v3  ;;  %v805_v49 = vld [vmem:[%s1016_s3] sm:$0xff]  }
  0x17   : > { %764 = vmatpush3.bf16.msra.mxu1 %v802_v25  ;;  %v731_v55 = vld [vmem:[%s891_s27 + $0x4] sm:$0x3] }
  0x18   : > { %v260_v5 = vld [vmem:[%s1018_s5] sm:$0x3]  ;;  %765 = vmatprep.subr.bf16.mxu1 %v840_v3 }
  0x19   : > { %v263_v6 = vpack.c.bf16 %v260_v5, %v260_v5  ;;  %758 = vmatpush3.bf16.msra.mxu0 %v801_v4  ;;  %v261_v14 = vld [vmem:[%s1019_s6] sm:$0x3] }
  0x1a   : > { %771 = vmatprep.subr.bf16.mxu0 %v840_v3 }
  0x1b   : > { %766 = vmatpush3.bf16.msra.mxu1 %v803_v26 }
  0x1c   : > { %760 = vmatmul.mubr.msk.bf16.vlgmr.msra.gmra.mxu0 %vm280_vm2, %v263_v6  ;;  %779 = vmatprep.subr.bf16.mxu1 %v840_v3 }
  0x1d   : > { %775 = vmatprep.mubr.msk.bf16.mxu0 %vm841_vm1, %v840_v3  ;;  %772 = vmatpush3.bf16.msra.mxu0 %v804_v48 }
  0x1e   : > { %773 = vmatprep.subr.bf16.mxu0 %v840_v3 }
  0x21   : > { %774 = vmatpush3.bf16.msra.mxu0 %v805_v49 }
  0xdc   : > { %v318_v8 = vpop.f32.mrf.mxu0 }
  0xdd   : > { %v324_v9 = vadd.f32 %v318_v8, %v262_v7  ;;  %v806_v8 = vld [vmem:[%s1016_s3 + $0x8] sm:$0xff]  }
  0xde   : > { %v761_v10 = vpop.f32.mrf.mxu0 }
  0xdf   : > { %808 = vtanh.f32 %v324_v9  ;;  %v325_v15 = vmul.f32 0.5, %v324_v9  ;;  %v807_v9 = vld [vmem:[%s1016_s3] sm:$0xff]  }
  0xe0   : > { %v321_v11 = vpop.f32.mrf.mxu0 }
  0xe1   : > { %810 = vtanh.f32 %v325_v15  ;;  %v736_v15 = vld [vmem:[%s891_s27 + $0x6] sm:$0x3]  ;;  %s844_s27 = smov 96  }
  0xe2   : > { %v762_v12 = vpop.f32.mrf.mxu0 }
  0xec   : > { %v809_v13 = vpop.eup %808 }
  0xed   : > { %336 = vrot.lane.b32.xlu0 %v809_v13, %s842_s22 }
  0xee   : > { %v811_v16 = vpop.eup %810 }
  0xef   : > { %v327_v17 = vmul.f32 0.5, %v811_v16 }
  0xf1   : > { %331 = vrot.lane.b32.xlu0 %v261_v14, %s843_s25  ;;  %v328_v18 = vadd.f32 0.5, %v327_v17 }
 0x15f   : > { %v337_v19 = vpop.permute.xlu0 %336 }
 0x160   : > { %v339_v20 = vmul.f32 %v337_v19, %v328_v18 }
 0x162   : > { %341 = vrot.lane.b32.xlu1 %v339_v20, %s843_s25 }
 0x163   : > { %v332_v21 = vpop.permute.xlu0 %331 }
 0x164   : > { %v334_v22 = vmul.f32 %v332_v21, %v328_v18 }
 0x1d4   : > { %v342_v23 = vpop.permute.xlu1 %341 }
 0x1d5   : > { %v344_v24 = vadd.f32 %v342_v23, %v334_v22 }
 0x1d7   : > { %812 = vtanh.f32 %v344_v24 }
 0x1e4   : > { %v813_v27 = vpop.eup %812 }
 0x1e5   : > { %347 = vrot.lane.b32.xlu1 %v813_v27, %s842_s22 }
 0x257   : > { %v348_v28 = vpop.permute.xlu1 %347 }
 0x258   : > { %v946_v29 = vmul.f32 %v348_v28, %v328_v18 }
 0x25a   : > { %v359_v30 = vpack.c.bf16 %v946_v29, %v946_v29 }
 0x25c   : > { %365 = vrot.lane.b32.xlu0 %v359_v30, %s843_s25 }
 0x2ce   : > { %v366_v31 = vpop.permute.xlu0 %365 }
 0x2cf   : > { %768 = vmatmul.mubr.msk.bf16.vlgmr.msra.gmra.mxu1 %vm280_vm2, %v366_v31 }
 0x2d0   : > { %783 = vmatprep.mubr.msk.bf16.mxu1 %vm841_vm1, %v840_v3  ;;  %780 = vmatpush3.bf16.msra.mxu1 %v806_v8 }
 0x2d1   : > { %781 = vmatprep.subr.bf16.mxu1 %v840_v3 }
 0x2d4   : > { %782 = vmatpush3.bf16.msra.mxu1 %v807_v9 }
 0x38f   : > { %v416_v33 = vpop.f32.mrf.mxu1 }
 0x390   : > { %v422_v34 = vadd.f32 %v726_v32, %v416_v33 }
 0x391   : > { %v769_v35 = vpop.f32.mrf.mxu1 }
 0x392   : > { %814 = vtanh.f32 %v422_v34  ;;  %v423_v39 = vmul.f32 0.5, %v422_v34 }
 0x393   : > { %v419_v36 = vpop.f32.mrf.mxu1 }
 0x394   : > { %816 = vtanh.f32 %v423_v39 }
 0x395   : > { %v770_v37 = vpop.f32.mrf.mxu1 }
 0x39f   : > { %v815_v38 = vpop.eup %814 }
 0x3a0   : > { %430 = vrot.lane.b32.xlu1 %v815_v38, %s842_s22 }
 0x3a1   : > { %v817_v40 = vpop.eup %816 }
 0x3a2   : > { %v425_v41 = vmul.f32 0.5, %v817_v40 }
 0x3a4   : > { %v426_v42 = vadd.f32 0.5, %v425_v41 }
 0x3a6   : > { %v428_v45 = vmul.f32 %v426_v42, %v344_v24 }
 0x412   : > { %v431_v43 = vpop.permute.xlu1 %430 }
 0x413   : > { %v433_v44 = vmul.f32 %v431_v43, %v426_v42 }
 0x415   : > { %435 = vrot.lane.b32.xlu0 %v433_v44, %s843_s25 }
 0x487   : > { %v436_v46 = vpop.permute.xlu0 %435 }
 0x488   : > { %v438_v47 = vadd.f32 %v436_v46, %v428_v45 }
 0x48a   : > { %818 = vtanh.f32 %v438_v47 }
 0x497   : > { %v819_v50 = vpop.eup %818 }
 0x498   : > { %441 = vrot.lane.b32.xlu1 %v819_v50, %s842_s22 }
 0x50a   : > { %v442_v51 = vpop.permute.xlu1 %441 }
 0x50b   : > { %v965_v52 = vmul.f32 %v442_v51, %v426_v42 }
 0x50d   : > { %v453_v53 = vpack.c.bf16 %v965_v52, %v965_v52 }
 0x50f   : > { %459 = vrot.lane.b32.xlu0 %v453_v53, %s843_s25 }
 0x581   : > { %v460_v54 = vpop.permute.xlu0 %459 }
 0x582   : > { %776 = vmatmul.mubr.msk.bf16.vlgmr.msra.gmra.mxu0 %vm280_vm2, %v460_v54 }
 0x642   : > { %v510_v56 = vpop.f32.mrf.mxu0 }
 0x643   : > { %v516_v57 = vadd.f32 %v731_v55, %v510_v56 }
 0x644   : > { %v777_v58 = vpop.f32.mrf.mxu0 }
 0x645   : > { %820 = vtanh.f32 %v516_v57  ;;  %v517_v62 = vmul.f32 0.5, %v516_v57 }
 0x646   : > { %v513_v59 = vpop.f32.mrf.mxu0 }
 0x647   : > { %822 = vtanh.f32 %v517_v62 }
 0x648   : > { %v778_v60 = vpop.f32.mrf.mxu0 }
 0x652   : > { %v821_v61 = vpop.eup %820 }
 0x653   : > { %524 = vrot.lane.b32.xlu1 %v821_v61, %s842_s22 }
 0x654   : > { %v823_v63 = vpop.eup %822 }
 0x655   : > { %v519_v0 = vmul.f32 0.5, %v823_v63 }
 0x657   : > { %v520_v1 = vadd.f32 0.5, %v519_v0 }
 0x659   : > { %v522_v5 = vmul.f32 %v520_v1, %v438_v47 }
 0x6c5   : > { %v525_v2 = vpop.permute.xlu1 %524 }
 0x6c6   : > { %v527_v4 = vmul.f32 %v525_v2, %v520_v1 }
 0x6c8   : > { %529 = vrot.lane.b32.xlu0 %v527_v4, %s843_s25 }
 0x73a   : > { %v530_v6 = vpop.permute.xlu0 %529 }
 0x73b   : > { %v532_v7 = vadd.f32 %v530_v6, %v522_v5 }
 0x73d   : > { %824 = vtanh.f32 %v532_v7 }
 0x74a   : > { %v825_v10 = vpop.eup %824 }
 0x74b   : > { %535 = vrot.lane.b32.xlu1 %v825_v10, %s842_s22 }
 0x7bd   : > { %v536_v11 = vpop.permute.xlu1 %535 }
 0x7be   : > { %v538_v12 = vmul.f32 %v536_v11, %v520_v1 }
 0x7c0   : > { %v547_v13 = vpack.c.bf16 %v538_v12, %v538_v12 }
 0x7c2   : > { %553 = vrot.lane.b32.xlu0 %v547_v13, %s843_s25 }
 0x834   : > { %v554_v14 = vpop.permute.xlu0 %553 }
 0x835   : > { %784 = vmatmul.mubr.msk.bf16.vlgmr.msra.gmra.mxu1 %vm280_vm2, %v554_v14 }
 0x8f5   : > { %v604_v16 = vpop.f32.mrf.mxu1 }
 0x8f6   : > { %v610_v17 = vadd.f32 %v736_v15, %v604_v16 }
 0x8f7   : > { %v785_v18 = vpop.f32.mrf.mxu1 }
 0x8f8   : > { %826 = vtanh.f32 %v610_v17  ;;  %v611_v21 = vmul.f32 0.5, %v610_v17 }
 0x8f9   : > { %v607_v19 = vpop.f32.mrf.mxu1 }
 0x8fa   : > { %828 = vtanh.f32 %v611_v21 }
 0x8fb   : > { %v786_v20 = vpop.f32.mrf.mxu1 }
 0x905   : > { %v827_v3 = vpop.eup %826 }
 0x906   : > { %618 = vrot.lane.b32.xlu1 %v827_v3, %s842_s22 }
 0x907   : > { %v829_v22 = vpop.eup %828 }
 0x908   : > { %v613_v23 = vmul.f32 0.5, %v829_v22 }
 0x90a   : > { %v614_v24 = vadd.f32 0.5, %v613_v23 }
 0x90c   : > { %v616_v27 = vmul.f32 %v614_v24, %v532_v7 }
 0x978   : > { %v619_v25 = vpop.permute.xlu1 %618 }
 0x979   : > { %v621_v26 = vmul.f32 %v619_v25, %v614_v24 }
 0x97b   : > { %623 = vrot.lane.b32.xlu0 %v621_v26, %s843_s25 }
 0x97f   : > { %352 = vrot.lane.b32.xlu0 %v946_v29, %s843_s25 }
 0x983   : > { %540 = vrot.lane.b32.xlu0 %v538_v12, %s843_s25 }
 0x9ed   : > { %v624_v28 = vpop.permute.xlu0 %623 }
 0x9ee   : > { %v626_v30 = vadd.f32 %v624_v28, %v616_v27 }
 0x9f0   : > { %830 = vtanh.f32 %v626_v30  ;;  %641 = vrot.lane.b32.xlu0 %v626_v30, %s844_s27 }
 0x9f1   : > { %v353_v31 = vpop.permute.xlu0 %352 }
 0x9f2   : > { %356 = vst.msk [vmem:[%s896_s30] sm:$0x3] %vm355_vm3, %v353_v31 }
 0x9f5   : > { %v541_v29 = vpop.permute.xlu0 %540 }
 0x9f6   : > { %735 = vst.msk [vmem:[%s896_s30 + $0x4] sm:$0x3] %vm355_vm3, %v541_v29 }
 0x9fd   : > { %v831_v32 = vpop.eup %830 }
 0x9fe   : > { %629 = vrot.lane.b32.xlu1 %v831_v32, %s842_s22 }
 0xa02   : > { %446 = vrot.lane.b32.xlu1 %v965_v52, %s843_s25 }
 0xa62   : > { %v642_v33 = vpop.permute.xlu0 %641 }
 0xa63   : > { %644 = vst.msk [vmem:[%s1019_s6] sm:$0x3] %vm355_vm3, %v642_v33 }
 0xa70   : > { %v630_v34 = vpop.permute.xlu1 %629 }
 0xa71   : > { %v632_v35 = vmul.f32 %v630_v34, %v614_v24 }
 0xa73   : > { %634 = vrot.lane.b32.xlu1 %v632_v35, %s843_s25 }
 0xa74   : > { %v447_v36 = vpop.permute.xlu1 %446 }
 0xa75   : > { %730 = vst.msk [vmem:[%s896_s30 + $0x2] sm:$0x3] %vm355_vm3, %v447_v36 }
 0xae5   : > { %v635_v37 = vpop.permute.xlu1 %634 }
 0xae6   : > { %740 = vst.msk [vmem:[%s896_s30 + $0x6] sm:$0x3] %vm355_vm3, %v635_v37  ;;  %639 = vst.msk [vmem:[%s1018_s5] sm:$0x3] %vm355_vm3, %v635_v37 }
 0xae7 PF: > { %s17_s21 = sadd.s32 1, %s838_s21  }
 0xae8   : > { %p14_p5 = scmp.ge.s32.totalorder %s17_s21, 4  }
 0xaea   :  { %16 = sbr.rel (!%p14_p5) target bundleno = 1 (0x1), region = 92 }

// kernel: vanilla_lstm_forward.7
= control target key start
LH: loop header
LB: loop body
LE: loop exit
PB: predicated region body
PF: predicated region fallthrough
CT: control target
= control target key end

     0   :  { %s1259_s27 = smov 0   ;;  %s1427_s0 = inlined_call_operand.vmem [shape: f32[8,2,128], index: 0, kind: input, shape index: {}]   ;;  %s1428_s1 = inlined_call_operand.vmem [shape: f32[2,32], index: 1, kind: input, shape index: {}]   ;;  %s1429_s2 = inlined_call_operand.vmem [shape: f32[2,32], index: 2, kind: input, shape index: {}]   ;;  %s1430_s3 = inlined_call_operand.vmem [shape: bf16[32,128], index: 3, kind: input, shape index: {}]   ;;  %s1431_s4 = inlined_call_operand.vmem [shape: bf16[32,128], index: 4, kind: input, shape index: {}]   ;;  %s1432_s5 = inlined_call_operand.vmem [shape: f32[1,128], index: 5, kind: input, shape index: {}]   ;;  %s1433_s6 = inlined_call_operand.vmem [shape: f32[8,2,128], index: 6, kind: output, shape index: {0}]   ;;  %s1434_s7 = inlined_call_operand.vmem [shape: f32[2,32], index: 7, kind: output, shape index: {1}]   ;;  %s1435_s8 = inlined_call_operand.vmem [shape: f32[2,32], index: 8, kind: output, shape index: {2}]  }
   0x1 LB: > { %s1014_s28 = sadd.s32 4294967295, %s1207_s27   ;;  %p1018_p0 = scmp.ge.s32.totalorder %s1207_s27, 1  ;;  %s1207_s27 = sphi %s1259_s27, %s19_s27  }
   0x2   : > { %p258_p1 = scmp.lt.s32.totalorder %s1207_s27, 3 }
   0x4   : > { %p259_p2 = pnand %p1018_p0, %p258_p1 }
   0x5   : > { %s1019_s29 = sshll.u32 (!%p259_p2), %s1014_s28, 2  ;;  %p1023_p4 = scmp.ne.s32.totalorder (!%p259_p2), %s1014_s28, 0 }
   0x6   : > { %262 = sbr.rel (%p259_p2) target bundleno = 2991 (0xbaf), region = 44  ;;  %p293_p3 = scmp.lt.s32.totalorder (!%p259_p2), %s1019_s29, 7 }
   0xb   : > { %s1437_s29 = smov (!%p293_p3, %s1019_s29), 7  ;;  %308 = sbr.rel (%p1023_p4) target bundleno = 19 (0x13), region = 48 }
   0xc   : > { %s1020_s30 = sshll.u32 %s1437_s29, 1 }
   0xd   : > { %s1270_s11 = scalar_lea.vmem %s1427_s0, %s1020_s30  ;;  %s1275_s14 = scalar_lea.vmem %s1433_s6, %s1020_s30 }
  0x10   : > { %v309_v0 = vld [vmem:[%s1428_s1] sm:$0x3]  ;;  %vm310_vm0 = vcmask 254976  }
  0x11   : > { %v312_v1 = vld [vmem:[%s1429_s2] sm:$0x3]  ;;  %311 = vst.msk [vmem:[%s1434_s7] sm:$0x3] %vm310_vm0, %v309_v0 }
  0x12   : > { %313 = vst.msk [vmem:[%s1435_s8] sm:$0x3] %vm310_vm0, %v312_v1 }
  0x13 PF: > { %v1161_v2 = vld [vmem:[%s1430_s3 + $0x8] sm:$0xff]   ;;  %v1209_v3 = vmov 0.0   ;;  %v1162_v4 = vld [vmem:[%s1430_s3] sm:$0xff]   ;;  %vm1210_vm1 = vmmov 0   ;;  %vm334_vm2 = vcmask 261120   ;;  %s1211_s30 = smov 64  }
  0x14   : > { %1084 = vmatprep.subr.bf16.mxu0 %v1209_v3  ;;  %1092 = vmatprep.subr.bf16.mxu1 %v1209_v3  ;;  %v316_v7 = vld [vmem:[%s1270_s11] sm:$0x3]  ;;  %s1212_s12 = smov 32   ;;  %v1163_v25 = vld [vmem:[%s1430_s3 + $0x8] sm:$0xff]   ;;  %v1031_v35 = vld [vmem:[%s1270_s11 + $0x2] sm:$0x3] }
  0x15   : > { %1085 = vmatpush3.bf16.msra.mxu0 %v1161_v2  ;;  %1088 = vmatprep.mubr.msk.bf16.mxu0 %vm1210_vm1, %v1209_v3  ;;  %v1164_v26 = vld [vmem:[%s1431_s4 + $0x8] sm:$0xff]   ;;  %v1165_v27 = vld [vmem:[%s1430_s3] sm:$0xff]   ;;  %s1213_s26 = smov 96   ;;  %vm939_vm3 = vcmask 254976  }
  0x16   : > { %1086 = vmatprep.subr.bf16.mxu0 %v1209_v3  ;;  %1096 = vmatprep.mubr.msk.bf16.mxu1 %vm1210_vm1, %v1209_v3  ;;  %v1166_v28 = vld [vmem:[%s1431_s4] sm:$0xff]   ;;  %v1167_v56 = vld [vmem:[%s1430_s3 + $0x8] sm:$0xff]  }
  0x17   : > { %1093 = vmatpush3.bf16.msra.mxu1 %v1164_v26  ;;  %v1343_v34 = vld [vmem:[%s1432_s5] ss:$0 sm:$0xff]  ;;  %v1168_v57 = vld [vmem:[%s1431_s4 + $0x8] sm:$0xff]   ;;  %v1040_v1 = vld [vmem:[%s1270_s11 + $0x4] sm:$0x3] }
  0x18   : > { %v314_v5 = vld [vmem:[%s1434_s7] sm:$0x3]  ;;  %1094 = vmatprep.subr.bf16.mxu1 %v1209_v3 }
  0x19   : > { %v317_v6 = vpack.c.bf16 %v314_v5, %v314_v5  ;;  %1087 = vmatpush3.bf16.msra.mxu0 %v1162_v4  ;;  %v315_v14 = vld [vmem:[%s1435_s8] sm:$0x3] }
  0x1a   : > { %1100 = vmatprep.subr.bf16.mxu0 %v1209_v3  ;;  %v1169_v58 = vld [vmem:[%s1430_s3] sm:$0xff]  }
  0x1b   : > { %1095 = vmatpush3.bf16.msra.mxu1 %v1166_v28  ;;  %v1170_v59 = vld [vmem:[%s1431_s4] sm:$0xff]  }
  0x1c   : > { %1089 = vmatmul.mubr.msk.bf16.vlgmr.msra.gmra.mxu0 %vm334_vm2, %v317_v6  ;;  %1108 = vmatprep.subr.bf16.mxu1 %v1209_v3  ;;  %v1174_v26 = vld [vmem:[%s1431_s4] sm:$0xff]  }
  0x1d   : > { %1104 = vmatprep.mubr.msk.bf16.mxu0 %vm1210_vm1, %v1209_v3  ;;  %1101 = vmatpush3.bf16.msra.mxu0 %v1163_v25  ;;  %v1173_v25 = vld [vmem:[%s1430_s3] sm:$0xff]  }
  0x1e   : > { %1102 = vmatprep.subr.bf16.mxu0 %v1209_v3 }
  0x21   : > { %1103 = vmatpush3.bf16.msra.mxu0 %v1165_v27 }
  0x22   : > { %1116 = vmatprep.subr.bf16.mxu0 %v1209_v3 }
  0xdc   : > { %v372_v8 = vpop.f32.mrf.mxu0 }
  0xdd   : > { %v378_v9 = vadd.f32 %v372_v8, %v316_v7 }
  0xde   : > { %v1090_v10 = vpop.f32.mrf.mxu0 }
  0xdf   : > { %1177 = vtanh.f32 %v378_v9  ;;  %v379_v15 = vmul.f32 0.5, %v378_v9 }
  0xe0   : > { %v375_v11 = vpop.f32.mrf.mxu0 }
  0xe1   : > { %1179 = vtanh.f32 %v379_v15 }
  0xe2   : > { %v1091_v12 = vpop.f32.mrf.mxu0 }
  0xec   : > { %v1178_v13 = vpop.eup %1177 }
  0xed   : > { %390 = vrot.lane.b32.xlu0 %v1178_v13, %s1211_s30 }
  0xee   : > { %v1180_v16 = vpop.eup %1179 }
  0xef   : > { %v381_v17 = vmul.f32 0.5, %v1180_v16 }
  0xf1   : > { %385 = vrot.lane.b32.xlu0 %v315_v14, %s1212_s12  ;;  %v382_v18 = vadd.f32 0.5, %v381_v17 }
 0x15f   : > { %v391_v19 = vpop.permute.xlu0 %390 }
 0x160   : > { %v393_v20 = vmul.f32 %v391_v19, %v382_v18 }
 0x162   : > { %395 = vrot.lane.b32.xlu1 %v393_v20, %s1212_s12 }
 0x163   : > { %v386_v21 = vpop.permute.xlu0 %385 }
 0x164   : > { %v388_v22 = vmul.f32 %v386_v21, %v382_v18 }
 0x1d4   : > { %v396_v23 = vpop.permute.xlu1 %395 }
 0x1d5   : > { %v398_v24 = vadd.f32 %v396_v23, %v388_v22  ;;  %v1171_v23 = vld [vmem:[%s1430_s3 + $0x8] sm:$0xff]  }
 0x1d7   : > { %1181 = vtanh.f32 %v398_v24 }
 0x1e4   : > { %v1182_v29 = vpop.eup %1181 }
 0x1e5   : > { %401 = vrot.lane.b32.xlu1 %v1182_v29, %s1211_s30 }
 0x257   : > { %v402_v30 = vpop.permute.xlu1 %401 }
 0x258   : > { %v404_v31 = vmul.f32 %v402_v30, %v382_v18 }
 0x25a   : > { %v405_v32 = vpack.c.bf16 %v404_v31, %v404_v31 }
 0x25c   : > { %418 = vrot.lane.b32.xlu0 %v405_v32, %s1212_s12  ;;  %v1049_v32 = vld [vmem:[%s1270_s11 + $0x6] sm:$0x3] }
 0x2ce   : > { %v419_v33 = vpop.permute.xlu0 %418 }
 0x2cf   : > { %1097 = vmatmul.mubr.msk.bf16.vlgmr.msra.gmra.mxu1 %vm334_vm2, %v419_v33  ;;  %1105 = vmatmul.mubr.msk.bf16.vlgmr.msra.gmra.mxu0 %vm334_vm2, %v419_v33 }
 0x2d0   : > { %1112 = vmatprep.mubr.msk.bf16.mxu1 %vm1210_vm1, %v1209_v3  ;;  %1120 = vmatprep.mubr.msk.bf16.mxu0 %vm1210_vm1, %v1209_v3 }
 0x2d1   : > { %1117 = vmatpush3.bf16.msra.mxu0 %v1167_v56  ;;  %1109 = vmatpush3.bf16.msra.mxu1 %v1168_v57 }
 0x2d2   : > { %1118 = vmatprep.subr.bf16.mxu0 %v1209_v3  ;;  %1110 = vmatprep.subr.bf16.mxu1 %v1209_v3 }
 0x2d5   : > { %1119 = vmatpush3.bf16.msra.mxu0 %v1169_v58  ;;  %1111 = vmatpush3.bf16.msra.mxu1 %v1170_v59 }
 0x2d6   : > { %1132 = vmatprep.subr.bf16.mxu0 %v1209_v3  ;;  %1124 = vmatprep.subr.bf16.mxu1 %v1209_v3 }
 0x38f   : > { %v469_v36 = vpop.f32.mrf.mxu1  ;;  %v528_v37 = vpop.f32.mrf.mxu0 }
 0x390   : > { %v470_v38 = vadd.f32 %v1343_v34, %v469_v36  ;;  %v534_v39 = vadd.f32 %v1031_v35, %v528_v37 }
 0x391   : > { %v1098_v40 = vpop.f32.mrf.mxu1  ;;  %v1106_v41 = vpop.f32.mrf.mxu0 }
 0x392   : > { %475 = vst [vmem:[%s1275_s14] sm:$0x3] %v470_v38  ;;  %1183 = vtanh.f32 %v534_v39  ;;  %v535_v47 = vmul.f32 0.5, %v534_v39 }
 0x393   : > { %v472_v42 = vpop.f32.mrf.mxu1  ;;  %v531_v43 = vpop.f32.mrf.mxu0 }
 0x394   : > { %1185 = vtanh.f32 %v535_v47 }
 0x395   : > { %v1099_v44 = vpop.f32.mrf.mxu1  ;;  %v1107_v45 = vpop.f32.mrf.mxu0 }
 0x39f   : > { %v1184_v46 = vpop.eup %1183 }
 0x3a0   : > { %542 = vrot.lane.b32.xlu1 %v1184_v46, %s1211_s30 }
 0x3a1   : > { %v1186_v48 = vpop.eup %1185 }
 0x3a2   : > { %v537_v49 = vmul.f32 0.5, %v1186_v48 }
 0x3a4   : > { %v538_v50 = vadd.f32 0.5, %v537_v49 }
 0x3a6   : > { %v540_v53 = vmul.f32 %v538_v50, %v398_v24  ;;  %v1172_v24 = vld [vmem:[%s1431_s4 + $0x8] sm:$0xff]  }
 0x412   : > { %v543_v51 = vpop.permute.xlu1 %542 }
 0x413   : > { %v545_v52 = vmul.f32 %v543_v51, %v538_v50 }
 0x415   : > { %547 = vrot.lane.b32.xlu0 %v545_v52, %s1212_s12 }
 0x487   : > { %v548_v54 = vpop.permute.xlu0 %547 }
 0x488   : > { %v550_v55 = vadd.f32 %v548_v54, %v540_v53  ;;  %v1175_v54 = vld [vmem:[%s1431_s4 + $0x8] sm:$0xff]  }
 0x48a   : > { %1187 = vtanh.f32 %v550_v55 }
 0x497   : > { %v1188_v60 = vpop.eup %1187 }
 0x498   : > { %553 = vrot.lane.b32.xlu1 %v1188_v60, %s1211_s30 }
 0x50a   : > { %v554_v61 = vpop.permute.xlu1 %553 }
 0x50b   : > { %v556_v62 = vmul.f32 %v554_v61, %v538_v50 }
 0x50d   : > { %v557_v63 = vpack.c.bf16 %v556_v62, %v556_v62 }
 0x50f   : > { %570 = vrot.lane.b32.xlu0 %v557_v63, %s1212_s12 }
 0x581   : > { %v571_v0 = vpop.permute.xlu0 %570 }
 0x582   : > { %1113 = vmatmul.mubr.msk.bf16.vlgmr.msra.gmra.mxu1 %vm334_vm2, %v571_v0  ;;  %1121 = vmatmul.mubr.msk.bf16.vlgmr.msra.gmra.mxu0 %vm334_vm2, %v571_v0 }
 0x583   : > { %1128 = vmatprep.mubr.msk.bf16.mxu1 %vm1210_vm1, %v1209_v3  ;;  %1136 = vmatprep.mubr.msk.bf16.mxu0 %vm1210_vm1, %v1209_v3 }
 0x584   : > { %1133 = vmatpush3.bf16.msra.mxu0 %v1171_v23  ;;  %1125 = vmatpush3.bf16.msra.mxu1 %v1172_v24 }
 0x585   : > { %1134 = vmatprep.subr.bf16.mxu0 %v1209_v3  ;;  %1126 = vmatprep.subr.bf16.mxu1 %v1209_v3 }
 0x588   : > { %1135 = vmatpush3.bf16.msra.mxu0 %v1173_v25  ;;  %1127 = vmatpush3.bf16.msra.mxu1 %v1174_v26 }
 0x589   : > { %1140 = vmatprep.subr.bf16.mxu1 %v1209_v3 }
 0x642   : > { %v621_v2 = vpop.f32.mrf.mxu1  ;;  %v681_v4 = vpop.f32.mrf.mxu0 }
 0x643   : > { %v622_v5 = vadd.f32 %v1343_v34, %v621_v2  ;;  %v687_v6 = vadd.f32 %v1040_v1, %v681_v4 }
 0x644   : > { %v1114_v7 = vpop.f32.mrf.mxu1  ;;  %v1122_v8 = vpop.f32.mrf.mxu0 }
 0x645   : > { %1039 = vst [vmem:[%s1275_s14 + $0x2] sm:$0x3] %v622_v5  ;;  %1189 = vtanh.f32 %v687_v6  ;;  %v688_v14 = vmul.f32 0.5, %v687_v6 }
 0x646   : > { %v624_v9 = vpop.f32.mrf.mxu1  ;;  %v684_v10 = vpop.f32.mrf.mxu0 }
 0x647   : > { %1191 = vtanh.f32 %v688_v14 }
 0x648   : > { %v1115_v11 = vpop.f32.mrf.mxu1  ;;  %v1123_v12 = vpop.f32.mrf.mxu0 }
 0x652   : > { %v1190_v13 = vpop.eup %1189 }
 0x653   : > { %695 = vrot.lane.b32.xlu1 %v1190_v13, %s1211_s30 }
 0x654   : > { %v1192_v15 = vpop.eup %1191 }
 0x655   : > { %v690_v16 = vmul.f32 0.5, %v1192_v15 }
 0x657   : > { %v691_v17 = vadd.f32 0.5, %v690_v16 }
 0x659   : > { %v693_v20 = vmul.f32 %v691_v17, %v550_v55  ;;  %v1176_v55 = vld [vmem:[%s1431_s4] sm:$0xff]  }
 0x6c5   : > { %v696_v18 = vpop.permute.xlu1 %695 }
 0x6c6   : > { %v698_v19 = vmul.f32 %v696_v18, %v691_v17 }
 0x6c8   : > { %700 = vrot.lane.b32.xlu0 %v698_v19, %s1212_s12 }
 0x73a   : > { %v701_v21 = vpop.permute.xlu0 %700 }
 0x73b   : > { %v703_v22 = vadd.f32 %v701_v21, %v693_v20 }
 0x73d   : > { %1193 = vtanh.f32 %v703_v22 }
 0x74a   : > { %v1194_v27 = vpop.eup %1193 }
 0x74b   : > { %706 = vrot.lane.b32.xlu1 %v1194_v27, %s1211_s30 }
 0x7bd   : > { %v707_v28 = vpop.permute.xlu1 %706 }
 0x7be   : > { %v709_v29 = vmul.f32 %v707_v28, %v691_v17 }
 0x7c0   : > { %v710_v30 = vpack.c.bf16 %v709_v29, %v709_v29 }
 0x7c2   : > { %723 = vrot.lane.b32.xlu0 %v710_v30, %s1212_s12 }
 0x834   : > { %v724_v31 = vpop.permute.xlu0 %723 }
 0x835   : > { %1129 = vmatmul.mubr.msk.bf16.vlgmr.msra.gmra.mxu1 %vm334_vm2, %v724_v31  ;;  %1137 = vmatmul.mubr.msk.bf16.vlgmr.msra.gmra.mxu0 %vm334_vm2, %v724_v31 }
 0x836   : > { %1144 = vmatprep.mubr.msk.bf16.mxu1 %vm1210_vm1, %v1209_v3  ;;  %1141 = vmatpush3.bf16.msra.mxu1 %v1175_v54 }
 0x837   : > { %1142 = vmatprep.subr.bf16.mxu1 %v1209_v3 }
 0x83a   : > { %1143 = vmatpush3.bf16.msra.mxu1 %v1176_v55 }
 0x8f5   : > { %v774_v33 = vpop.f32.mrf.mxu1  ;;  %v834_v35 = vpop.f32.mrf.mxu0 }
 0x8f6   : > { %v775_v36 = vadd.f32 %v1343_v34, %v774_v33  ;;  %v840_v37 = vadd.f32 %v1049_v32, %v834_v35 }
 0x8f7   : > { %v1130_v38 = vpop.f32.mrf.mxu1  ;;  %v1138_v39 = vpop.f32.mrf.mxu0 }
 0x8f8   : > { %1048 = vst [vmem:[%s1275_s14 + $0x4] sm:$0x3] %v775_v36  ;;  %1195 = vtanh.f32 %v840_v37  ;;  %v841_v45 = vmul.f32 0.5, %v840_v37 }
 0x8f9   : > { %v777_v40 = vpop.f32.mrf.mxu1  ;;  %v837_v41 = vpop.f32.mrf.mxu0 }
 0x8fa   : > { %1197 = vtanh.f32 %v841_v45 }
 0x8fb   : > { %v1131_v42 = vpop.f32.mrf.mxu1  ;;  %v1139_v43 = vpop.f32.mrf.mxu0 }
 0x905   : > { %v1196_v44 = vpop.eup %1195 }
 0x906   : > { %848 = vrot.lane.b32.xlu1 %v1196_v44, %s1211_s30 }
 0x907   : > { %v1198_v46 = vpop.eup %1197 }
 0x908   : > { %v843_v47 = vmul.f32 0.5, %v1198_v46 }
 0x90a   : > { %v844_v48 = vadd.f32 0.5, %v843_v47 }
 0x90c   : > { %v846_v51 = vmul.f32 %v844_v48, %v703_v22 }
 0x978   : > { %v849_v49 = vpop.permute.xlu1 %848 }
 0x979   : > { %v851_v50 = vmul.f32 %v849_v49, %v844_v48 }
 0x97b   : > { %853 = vrot.lane.b32.xlu0 %v851_v50, %s1212_s12 }
 0x9ed   : > { %v854_v52 = vpop.permute.xlu0 %853 }
 0x9ee   : > { %v856_v53 = vadd.f32 %v854_v52, %v846_v51 }
 0x9f0   : > { %1199 = vtanh.f32 %v856_v53 }
 0x9fd   : > { %v1200_v56 = vpop.eup %1199 }
 0x9fe   : > { %859 = vrot.lane.b32.xlu1 %v1200_v56, %s1211_s30 }
 0xa70   : > { %v860_v57 = vpop.permute.xlu1 %859 }
 0xa71   : > { %v862_v58 = vmul.f32 %v860_v57, %v844_v48 }
 0xa73   : > { %v863_v59 = vpack.c.bf16 %v862_v58, %v862_v58  ;;  %936 = vrot.lane.b32.xlu1 %v862_v58, %s1212_s12 }
 0xa75   : > { %876 = vrot.lane.b32.xlu0 %v863_v59, %s1212_s12 }
 0xa79   : > { %942 = vrot.lane.b32.xlu0 %v856_v53, %s1213_s26 }
 0xae5   : > { %v937_v60 = vpop.permute.xlu1 %936 }
 0xae6   : > { %940 = vst.msk [vmem:[%s1434_s7] sm:$0x3] %vm939_vm3, %v937_v60 }
 0xae7   : > { %v877_v3 = vpop.permute.xlu0 %876 }
 0xae8   : > { %1145 = vmatmul.mubr.msk.bf16.vlgmr.msra.gmra.mxu1 %vm334_vm2, %v877_v3 }
 0xaeb   : > { %v943_v61 = vpop.permute.xlu0 %942 }
 0xaec   : > { %945 = vst.msk [vmem:[%s1435_s8] sm:$0x3] %vm939_vm3, %v943_v61 }
 0xba8   : > { %v927_v62 = vpop.f32.mrf.mxu1 }
 0xba9   : > { %v928_v63 = vadd.f32 %v1343_v34, %v927_v62 }
 0xbaa   : > { %v1146_v0 = vpop.f32.mrf.mxu1 }
 0xbab   : > { %1057 = vst [vmem:[%s1275_s14 + $0x6] sm:$0x3] %v928_v63 }
 0xbac   : > { %v930_v1 = vpop.f32.mrf.mxu1 }
 0xbae   : > { %v1147_v2 = vpop.f32.mrf.mxu1 }
 0xbaf PF: > { %s19_s27 = sadd.s32 1, %s1207_s27  }
 0xbb0   : > { %p16_p5 = scmp.ge.s32.totalorder %s19_s27, 4  }
 0xbb2   :  { %18 = sbr.rel (!%p16_p5) target bundleno = 1 (0x1), region = 100 }

</bundles_post_ra>
